<compile_context>
chip_gen: v7x
topology: tpu7x:2x2x1
jax: 0.10.0
libtpu: 0.0.40
codegen_flags: <defaults>
</compile_context>

<pallas_src>
import functools
import math

import jax
import jax.numpy as jnp
from jax.experimental import pallas as pl
from jax.experimental.pallas import tpu as pltpu


MATMUL_DTYPE = jnp.bfloat16   # MXU operand dtype (accumulation stays f32)
ACT_DTYPE = jnp.bfloat16      # dtype of q / kv intermediates written to HBM

_LN_EPS = 1e-6                # SegFormer uses nn.LayerNorm(dim, eps=1e-06)


# ------------------------------ small helpers -------------------------------

def _pick_row_tile(rows, bytes_per_row, target_bytes=2 << 20):
    """Largest row tile that is a multiple of 8, divides `rows`, stays under a
    VMEM byte budget and leaves >= 2 grid steps when possible (megacore)."""
    if rows % 8 != 0:
        # TODO(synk): odd row counts fall back to a single full-array grid step.
        return rows
    budget_rows = max(8, int(target_bytes) // max(int(bytes_per_row), 1))
    cap = min(budget_rows, max(rows // 2, 8))
    cap -= cap % 8
    t = max(cap, 8)
    while t >= 8:
        if rows % t == 0:
            return t
        t -= 8
    return rows


def _pick_ffn_rows(H, W, hidden, target_bytes=2 << 20):
    """Spatial rows (of H) per FFN tile: a divisor of H whose (rows*W, hidden)
    f32 fc1 activation stays under the budget; prefer >= 2 tiles along H."""
    if H <= 1:
        return max(H, 1)
    budget = max(1, int(target_bytes) // max(1, W * hidden * 4))
    cap = min(budget, max(H // 2, 1))
    th = 1
    for cand in range(1, H + 1):
        if H % cand == 0 and cand <= cap:
            th = cand
    return th


def _layernorm_f32(x, g, b):
    mu = jnp.mean(x, axis=-1, keepdims=True)
    xc = x - mu
    var = jnp.mean(xc * xc, axis=-1, keepdims=True)
    return xc * jax.lax.rsqrt(var + _LN_EPS) * g + b


# Exact (erf-based) GELU, matching torch.nn.GELU() default; erf via the
# Abramowitz & Stegun 7.1.26 polynomial (|err| <= 1.5e-7), only exp/div needed.
_ERF_A1 = 0.254829592
_ERF_A2 = -0.284496736
_ERF_A3 = 1.421413741
_ERF_A4 = -1.453152027
_ERF_A5 = 1.061405429
_ERF_P = 0.3275911


def _erf_poly(x):
    s = jnp.where(x >= 0.0, 1.0, -1.0)
    z = jnp.abs(x)
    t = 1.0 / (1.0 + _ERF_P * z)
    poly = ((((_ERF_A5 * t + _ERF_A4) * t + _ERF_A3) * t + _ERF_A2) * t + _ERF_A1) * t
    return s * (1.0 - poly * jnp.exp(-z * z))


def _gelu_exact(x):
    return 0.5 * x * (1.0 + _erf_poly(x * 0.7071067811865476))


# ----------------------------- Pallas kernels -------------------------------

def _ln_qkv_kernel(x_ref, g_ref, b_ref, wqkv_ref, bqkv_ref, q_ref, kv_ref):
    """sr_ratio == 1 path: shared LayerNorm + fused [Q|K|V] projection (one dot)."""
    C = x_ref.shape[1]
    xn = _layernorm_f32(x_ref[...].astype(jnp.float32), g_ref[...], b_ref[...])
    qkv = jnp.dot(xn.astype(MATMUL_DTYPE), wqkv_ref[...].astype(MATMUL_DTYPE),
                  preferred_element_type=jnp.float32) + bqkv_ref[...]
    q_ref[...] = qkv[:, :C].astype(q_ref.dtype)
    kv_ref[...] = qkv[:, C:].astype(kv_ref.dtype)


def _ln_q_xn_kernel(x_ref, g_ref, b_ref, wq_ref, bq_ref, q_ref, xn_ref):
    """sr_ratio > 1 path: shared LayerNorm + Q proj; also emit normalized x."""
    xn = _layernorm_f32(x_ref[...].astype(jnp.float32), g_ref[...], b_ref[...])
    q = jnp.dot(xn.astype(MATMUL_DTYPE), wq_ref[...].astype(MATMUL_DTYPE),
                preferred_element_type=jnp.float32) + bq_ref[...]
    q_ref[...] = q.astype(q_ref.dtype)
    xn_ref[...] = xn.astype(xn_ref.dtype)


def _sr_ln_kv_kernel(xs_ref, srw_ref, srb_ref, g_ref, b_ref, wkv_ref, bkv_ref,
                     kv_ref):
    """Spatial-reduction matmul + attn LayerNorm + fused K/V proj (one HBM pass)."""
    xr = jnp.dot(xs_ref[...].astype(MATMUL_DTYPE), srw_ref[...].astype(MATMUL_DTYPE),
                 preferred_element_type=jnp.float32) + srb_ref[...]
    xn = _layernorm_f32(xr, g_ref[...], b_ref[...])
    kv = jnp.dot(xn.astype(MATMUL_DTYPE), wkv_ref[...].astype(MATMUL_DTYPE),
                 preferred_element_type=jnp.float32) + bkv_ref[...]
    kv_ref[...] = kv.astype(kv_ref.dtype)


def _attn_out_kernel(q_ref, kv_ref, res_ref, wo_ref, bo_ref, o_ref, *, num_heads):
    """One (batch, query-row-tile) block: attention (all heads) + out-projection
    + residual.  Scale is pre-folded into Wq.  No per-head concatenate: each
    head's (tq, d) output is folded straight into the out-projection sum."""
    C = q_ref.shape[2]
    tq = q_ref.shape[1]
    d = C // num_heads
    q = q_ref[0]                                  # (tq, C), scale already folded
    kv = kv_ref[0]                                # (M, 2C): [K | V]

    out = jnp.zeros((tq, C), jnp.float32) + bo_ref[...]
    for h in range(num_heads):                    # static unroll; head split = lane slice
        qh = q[:, h * d:(h + 1) * d].astype(MATMUL_DTYPE)
        kh = kv[:, h * d:(h + 1) * d].astype(MATMUL_DTYPE)
        vh = kv[:, C + h * d:C + (h + 1) * d].astype(MATMUL_DTYPE)
        s = jax.lax.dot_general(qh, kh, (((1,), (1,)), ((), ())),
                                preferred_element_type=jnp.float32)
        s = s - jnp.max(s, axis=-1, keepdims=True)
        p = jnp.exp(s)
        p = p * pl.reciprocal(jnp.sum(p, axis=-1, keepdims=True), approx=False)
        oh = jnp.dot(p.astype(MATMUL_DTYPE), vh, preferred_element_type=jnp.float32)
        out = out + jnp.dot(oh.astype(MATMUL_DTYPE),
                            wo_ref[h * d:(h + 1) * d, :].astype(MATMUL_DTYPE),
                            preferred_element_type=jnp.float32)

    o_ref[0] = (out + res_ref[0].astype(jnp.float32)).astype(o_ref.dtype)


def _ffn_kernel(*refs, H, W, halo):
    """Fused MixFFN tile: LN -> fc1 -> depthwise 3x3 -> exact GELU -> fc2 -> +res.
    The 3x3 taps are pltpu.roll's of the flat (rows, hidden) fc1 activation with
    edge-column masks; the vertical halo comes from two extra W-row views of x1
    (zeroed at the image border) when the plane is tiled along H."""
    if halo:
        (xm_ref, xprev_ref, xnext_ref, g_ref, b_ref, w1_ref, b1_ref,
         dww_ref, dwb_ref, w2_ref, b2_ref, o_ref) = refs
    else:
        (xm_ref, g_ref, b_ref, w1_ref, b1_ref,
         dww_ref, dwb_ref, w2_ref, b2_ref, o_ref) = refs

    g = g_ref[...]
    b = b_ref[...]
    w1 = w1_ref[...].astype(MATMUL_DTYPE)
    b1 = b1_ref[...]

    def ln_fc1(xr):
        xn = _layernorm_f32(xr, g, b)
        return jnp.dot(xn.astype(MATMUL_DTYPE), w1,
                       preferred_element_type=jnp.float32) + b1

    x_main = xm_ref[0].astype(jnp.float32)                       # (rows, C)
    rows_main = x_main.shape[0]
    h_main = ln_fc1(x_main)                                      # (rows, hidden) f32

    if halo:
        i = pl.program_id(1)
        h_prev = ln_fc1(xprev_ref[0].astype(jnp.float32))        # (W, hidden)
        h_next = ln_fc1(xnext_ref[0].astype(jnp.float32))        # (W, hidden)
        h_prev = jnp.where(i > 0, h_prev, jnp.zeros_like(h_prev))
        h_next = jnp.where(i < pl.num_programs(1) - 1, h_next, jnp.zeros_like(h_next))
        h_ext = jnp.concatenate([h_prev, h_main, h_next], axis=0)
        lead = W
    else:
        h_ext = h_main
        lead = 0

    n_ext = h_ext.shape[0]
    pos = jax.lax.broadcasted_iota(jnp.int32, (n_ext, 1), 0)
    col = pos % W
    not_left = col > 0
    not_right = col < (W - 1)
    if halo:
        row_lo = None       # vertical border handled by the (zeroed) halo rows
        row_hi = None
    else:
        row_ix = pos // W
        row_lo = row_ix > 0
        row_hi = row_ix < (H - 1)

    w_dw = dww_ref[...].astype(jnp.float32)                      # (9, hidden), ki*3+kj
    acc = h_ext * w_dw[4:5, :]                                   # center tap
    for ki in range(3):
        for kj in range(3):
            if ki == 1 and kj == 1:
                continue
            off = (ki - 1) * W + (kj - 1)
            tap = pltpu.roll(h_ext, shift=(-off) % n_ext, axis=0)
            conds = []
            if ki == 0 and row_lo is not None:
                conds.append(row_lo)
            if ki == 2 and row_hi is not None:
                conds.append(row_hi)
            if kj == 0:
                conds.append(not_left)
            if kj == 2:
                conds.append(not_right)
            if conds:
                valid = conds[0]
                for c in conds[1:]:
                    valid = jnp.logical_and(valid, c)
                tap = jnp.where(valid, tap, 0.0)
            acc = acc + tap * w_dw[ki * 3 + kj:ki * 3 + kj + 1, :]

    conv = acc[lead:lead + rows_main, :] + dwb_ref[...]
    act = _gelu_exact(conv)                                      # exact GELU in-kernel
    f = jnp.dot(act.astype(MATMUL_DTYPE), w2_ref[...].astype(MATMUL_DTYPE),
                preferred_element_type=jnp.float32) + b2_ref[...]
    o_ref[0] = (f + x_main).astype(o_ref.dtype)


# ------------------------------ kernel wrappers ------------------------------

_PAR1 = pltpu.CompilerParams(dimension_semantics=("parallel",))
_PAR2 = pltpu.CompilerParams(dimension_semantics=("parallel", "parallel"))


def ln_qkv(x2d, g, b, wqkv, bqkv):
    R, C = x2d.shape
    tr = _pick_row_tile(R, bytes_per_row=4 * C + 2 * 3 * C + 4 * 3 * C)
    return pl.pallas_call(
        _ln_qkv_kernel,
        out_shape=(jax.ShapeDtypeStruct((R, C), ACT_DTYPE),
                   jax.ShapeDtypeStruct((R, 2 * C), ACT_DTYPE)),
        grid=(R // tr,),
        in_specs=[pl.BlockSpec((tr, C), lambda i: (i, 0)),
                  pl.BlockSpec((1, C), lambda i: (0, 0)),
                  pl.BlockSpec((1, C), lambda i: (0, 0)),
                  pl.BlockSpec((C, 3 * C), lambda i: (0, 0)),
                  pl.BlockSpec((1, 3 * C), lambda i: (0, 0))],
        out_specs=(pl.BlockSpec((tr, C), lambda i: (i, 0)),
                   pl.BlockSpec((tr, 2 * C), lambda i: (i, 0))),
        compiler_params=_PAR1,
    )(x2d, g.reshape(1, C), b.reshape(1, C), wqkv, bqkv.reshape(1, 3 * C))


def ln_q_xn(x2d, g, b, wq, bq):
    R, C = x2d.shape
    tr = _pick_row_tile(R, bytes_per_row=4 * C + 2 * C + 4 * C + 4 * C)
    return pl.pallas_call(
        _ln_q_xn_kernel,
        out_shape=(jax.ShapeDtypeStruct((R, C), ACT_DTYPE),
                   jax.ShapeDtypeStruct((R, C), jnp.float32)),
        grid=(R // tr,),
        in_specs=[pl.BlockSpec((tr, C), lambda i: (i, 0)),
                  pl.BlockSpec((1, C), lambda i: (0, 0)),
                  pl.BlockSpec((1, C), lambda i: (0, 0)),
                  pl.BlockSpec((C, C), lambda i: (0, 0)),
                  pl.BlockSpec((1, C), lambda i: (0, 0))],
        out_specs=(pl.BlockSpec((tr, C), lambda i: (i, 0)),
                   pl.BlockSpec((tr, C), lambda i: (i, 0))),
        compiler_params=_PAR1,
    )(x2d, g.reshape(1, C), b.reshape(1, C), wq, bq.reshape(1, C))


def sr_ln_kv(xs2d, sr_w, sr_b, g, b, wkv, bkv):
    R, K = xs2d.shape
    C = sr_w.shape[1]
    tr = _pick_row_tile(R, bytes_per_row=4 * K + 4 * C + 2 * 2 * C + 4 * 2 * C)
    return pl.pallas_call(
        _sr_ln_kv_kernel,
        out_shape=jax.ShapeDtypeStruct((R, 2 * C), ACT_DTYPE),
        grid=(R // tr,),
        in_specs=[pl.BlockSpec((tr, K), lambda i: (i, 0)),
                  pl.BlockSpec((K, C), lambda i: (0, 0)),
                  pl.BlockSpec((1, C), lambda i: (0, 0)),
                  pl.BlockSpec((1, C), lambda i: (0, 0)),
                  pl.BlockSpec((1, C), lambda i: (0, 0)),
                  pl.BlockSpec((C, 2 * C), lambda i: (0, 0)),
                  pl.BlockSpec((1, 2 * C), lambda i: (0, 0))],
        out_specs=pl.BlockSpec((tr, 2 * C), lambda i: (i, 0)),
        compiler_params=_PAR1,
    )(xs2d, sr_w, sr_b.reshape(1, C), g.reshape(1, C), b.reshape(1, C),
      wkv, bkv.reshape(1, 2 * C))


def attention_out(q, kv, res, wo, bo, num_heads):
    B, N, C = q.shape
    M = kv.shape[1]
    tq = _pick_row_tile(N, bytes_per_row=4 * (3 * C + 2 * M) + 2 * 3 * C)
    return pl.pallas_call(
        functools.partial(_attn_out_kernel, num_heads=num_heads),
        out_shape=jax.ShapeDtypeStruct((B, N, C), res.dtype),
        grid=(B, N // tq),
        in_specs=[pl.BlockSpec((1, tq, C), lambda bi, i: (bi, i, 0)),
                  pl.BlockSpec((1, M, 2 * C), lambda bi, i: (bi, 0, 0)),
                  pl.BlockSpec((1, tq, C), lambda bi, i: (bi, i, 0)),
                  pl.BlockSpec((C, C), lambda bi, i: (0, 0)),
                  pl.BlockSpec((1, C), lambda bi, i: (0, 0))],
        out_specs=pl.BlockSpec((1, tq, C), lambda bi, i: (bi, i, 0)),
        compiler_params=_PAR2,
    )(q, kv, res, wo, bo.reshape(1, C))


def mixffn_residual(x1, g, b, w1, b1, dw_w9, dw_b, w2, b2, H, W):
    B, N, C = x1.shape
    hidden = w1.shape[1]
    th = _pick_ffn_rows(H, W, hidden)
    halo = (th < H) and (W % 8 == 0) and ((th * W) % 8 == 0)
    if not halo:
        # TODO(synk): non-multiple-of-8 W falls back to one full (H,W) plane per step.
        th = H
    rows = th * W
    kernel = functools.partial(_ffn_kernel, H=H, W=W, halo=halo)

    main_spec = pl.BlockSpec((1, rows, C), lambda bi, i: (bi, i, 0))
    weight_specs = [
        pl.BlockSpec((1, C), lambda bi, i: (0, 0)),          # norm gamma
        pl.BlockSpec((1, C), lambda bi, i: (0, 0)),          # norm beta
        pl.BlockSpec((C, hidden), lambda bi, i: (0, 0)),     # fc1 w
        pl.BlockSpec((1, hidden), lambda bi, i: (0, 0)),     # fc1 b
        pl.BlockSpec((9, hidden), lambda bi, i: (0, 0)),     # dw weights (ki*3+kj, ch)
        pl.BlockSpec((1, hidden), lambda bi, i: (0, 0)),     # dw bias
        pl.BlockSpec((hidden, C), lambda bi, i: (0, 0)),     # fc2 w
        pl.BlockSpec((1, C), lambda bi, i: (0, 0)),          # fc2 b
    ]
    weight_args = (g.reshape(1, C), b.reshape(1, C), w1, b1.reshape(1, hidden),
                   dw_w9, dw_b.reshape(1, hidden), w2, b2.reshape(1, C))

    if halo:
        in_specs = [main_spec,
                    pl.BlockSpec((1, W, C),
                                 lambda bi, i: (bi, jnp.maximum(i * th - 1, 0), 0)),
                    pl.BlockSpec((1, W, C),
                                 lambda bi, i: (bi, jnp.minimum((i + 1) * th, H - 1), 0)),
                    ] + weight_specs
        args = (x1, x1, x1) + weight_args
    else:
        in_specs = [main_spec] + weight_specs
        args = (x1,) + weight_args

    return pl.pallas_call(
        kernel,
        out_shape=jax.ShapeDtypeStruct((B, N, C), x1.dtype),
        grid=(B, H // th),
        in_specs=in_specs,
        out_specs=pl.BlockSpec((1, rows, C), lambda bi, i: (bi, i, 0)),
        compiler_params=_PAR2,
    )(*args)


# --------------------------- SegLayer forward --------------------------------

def seg_layer_forward(p, in_data, H, W, num_heads, sr_ratio):
    B, N, C = in_data.shape
    x2d = in_data.reshape(B * N, C)

    if sr_ratio > 1:
        # K1: shared LN + Q proj (also emits normalized x for the KV path)
        q2d, xn2d = ln_q_xn(x2d, p['norm_g'], p['norm_b'], p['q_w'], p['q_b'])
        # TODO(synk): the spatial-reduction im2col below is still one XLA
        # transpose/reshape of xn; folding it into sr_ln_kv's BlockSpec would
        # remove this extra HBM round trip.
        Hs, Ws = H // sr_ratio, W // sr_ratio
        xs = xn2d.reshape(B, Hs, sr_ratio, Ws, sr_ratio, C)
        xs = xs.transpose(0, 1, 3, 2, 4, 5).reshape(B * Hs * Ws, sr_ratio * sr_ratio * C)
        # K2: sr matmul + attn LN + fused K/V proj
        kv2d = sr_ln_kv(xs, p['sr_w'], p['sr_b'], p['attn_norm_g'], p['attn_norm_b'],
                        p['kv_w'], p['kv_b'])
        M = Hs * Ws
    else:
        # K1: shared LN + fused [Q|K|V] projection (single dot, single HBM pass)
        q2d, kv2d = ln_qkv(x2d, p['norm_g'], p['norm_b'], p['qkv_w'], p['qkv_b'])
        M = N

    q = q2d.reshape(B, N, C)
    kv = kv2d.reshape(B, M, 2 * C)

    # K3: attention (query-row tiled, all heads) + out-proj + residual -> x1
    x1 = attention_out(q, kv, in_data, p['out_w'], p['out_b'], num_heads)

    # K4: shared LN + MixFFN (fc1 -> dwconv3x3 -> GELU -> fc2) + residual,
    #     spatially tiled over H with a 1-row halo.
    out = mixffn_residual(x1, p['norm_g'], p['norm_b'], p['fc1_w'], p['fc1_b'],
                          p['dw_w'], p['dw_b'], p['fc2_w'], p['fc2_b'], H, W)
    return out


# ------------------------------ parameters -----------------------------------

def make_params(key, C, hidden, sr, num_heads):
    ks = jax.random.split(key, 8)
    nrm = lambda k, shape, std: std * jax.random.normal(k, shape, jnp.float32)
    scale = float(C // num_heads) ** (-0.5)
    p = {}
    # shared LayerNorm of SegLayer
    p['norm_g'] = jnp.ones((C,), jnp.float32)
    p['norm_b'] = jnp.zeros((C,), jnp.float32)
    # attention projections (stored (in, out); trunc_normal(std=0.02) ~ normal*0.02)
    q_w = nrm(ks[0], (C, C), 0.02)
    q_b = jnp.zeros((C,), jnp.float32)
    k_w = nrm(ks[1], (C, C), 0.02)
    v_w = nrm(ks[2], (C, C), 0.02)
    kv_w = jnp.concatenate([k_w, v_w], axis=1)                # (C, 2C) = [K | V]
    kv_b = jnp.zeros((2 * C,), jnp.float32)
    # attention scale folded into Q at parameter-prep time
    p['q_w'] = q_w * scale
    p['q_b'] = q_b * scale
    p['kv_w'] = kv_w
    p['kv_b'] = kv_b
    p['qkv_w'] = jnp.concatenate([p['q_w'], kv_w], axis=1)    # (C, 3C) = [Q | K | V]
    p['qkv_b'] = jnp.concatenate([p['q_b'], kv_b], axis=0)
    p['out_w'] = nrm(ks[3], (C, C), 0.02)
    p['out_b'] = jnp.zeros((C,), jnp.float32)
    # spatial-reduction conv: torch weight (C_out, C_in, sr, sr), std = sqrt(2/fan_out)
    sr_std = math.sqrt(2.0 / (sr * sr * C))
    w_sr = nrm(ks[4], (C, C, sr, sr), sr_std)
    p['sr_w'] = jnp.transpose(w_sr, (2, 3, 1, 0)).reshape(sr * sr * C, C)
    p['sr_b'] = jnp.zeros((C,), jnp.float32)
    p['attn_norm_g'] = jnp.ones((C,), jnp.float32)
    p['attn_norm_b'] = jnp.zeros((C,), jnp.float32)
    # MixFFN
    p['fc1_w'] = nrm(ks[5], (C, hidden), 0.02)
    p['fc1_b'] = jnp.zeros((hidden,), jnp.float32)
    dw_std = math.sqrt(2.0 / 9.0)                             # fan_out/groups = 9
    w_dw = nrm(ks[6], (hidden, 1, 3, 3), dw_std)              # torch depthwise layout
    p['dw_w'] = jnp.transpose(w_dw[:, 0], (1, 2, 0)).reshape(9, hidden)  # (ki*3+kj, ch)
    p['dw_b'] = jnp.zeros((hidden,), jnp.float32)
    p['fc2_w'] = nrm(ks[7], (hidden, C), 0.02)
    p['fc2_b'] = jnp.zeros((C,), jnp.float32)
    return p


# --------------------------------- main ---------------------------------------

if __name__ == "__main__":
    key = jax.random.PRNGKey(0)
    k_x, k_p = jax.random.split(key)

    # Config A: sr_ratio > 1 branch (spatial-reduction KV path)
    B, C, H, W = 2, 32, 8, 8
    num_heads, sr_ratio, mlp_ratio = 2, 2, 4.0
    hidden = int(C * mlp_ratio)
    N = H * W
    in_data = jax.random.normal(k_x, (B, N, C), jnp.float32)
    params = make_params(k_p, C, hidden, sr_ratio, num_heads)
    fwd_a = jax.jit(functools.partial(seg_layer_forward, H=H, W=W,
                                      num_heads=num_heads, sr_ratio=sr_ratio))
    out_a = jax.block_until_ready(fwd_a(params, in_data))
    assert out_a.shape == (B, N, C) and out_a.dtype == jnp.float32
    assert bool(jnp.all(jnp.isfinite(out_a)))

    # Config B: sr_ratio == 1 branch (fused LN + [Q|K|V] kernel)
    num_heads_b, sr_b = 4, 1
    params_b = make_params(jax.random.fold_in(k_p, 1), C, hidden, sr_b, num_heads_b)
    fwd_b = jax.jit(functools.partial(seg_layer_forward, H=H, W=W,
                                      num_heads=num_heads_b, sr_ratio=sr_b))
    out_b = jax.block_until_ready(fwd_b(params_b, in_data))
    assert out_b.shape == (B, N, C) and out_b.dtype == jnp.float32
    assert bool(jnp.all(jnp.isfinite(out_b)))

    print("KERNEL_OK")
</pallas_src>

<mosaic_0001>
module attributes {stable_mosaic.version = 11 : i64} {
  func.func @_ln_q_xn_kernel(%arg0: i32, %arg1: memref<64x32xf32, #tpu.memory_space<vmem>>, %arg2: memref<1x32xf32, #tpu.memory_space<vmem>>, %arg3: memref<1x32xf32, #tpu.memory_space<vmem>>, %arg4: memref<32x32xf32, #tpu.memory_space<vmem>>, %arg5: memref<1x32xf32, #tpu.memory_space<vmem>>, %arg6: memref<64x32xbf16, #tpu.memory_space<vmem>>, %arg7: memref<64x32xf32, #tpu.memory_space<vmem>>) attributes {dimension_semantics = [#tpu.dimension_semantics<parallel>], iteration_bounds = array<i64: 2>, scalar_prefetch = 0 : i64, scratch_operands = 0 : i64, tpu.core_type = #tpu.core_type<tc>, window_params = [{transform_indices = @transform_0, window_bounds = array<i64: 64, 32>}, {pipeline_mode = #tpu.pipeline_mode<synchronous>, transform_indices = @transform_1, window_bounds = array<i64: 1, 32>}, {pipeline_mode = #tpu.pipeline_mode<synchronous>, transform_indices = @transform_2, window_bounds = array<i64: 1, 32>}, {pipeline_mode = #tpu.pipeline_mode<synchronous>, transform_indices = @transform_3, window_bounds = array<i64: 32, 32>}, {pipeline_mode = #tpu.pipeline_mode<synchronous>, transform_indices = @transform_4, window_bounds = array<i64: 1, 32>}, {transform_indices = @transform_5, window_bounds = array<i64: 64, 32>}, {transform_indices = @transform_6, window_bounds = array<i64: 64, 32>}]} {
    %c0 = arith.constant 0 : index
    %c0_0 = arith.constant 0 : index
    %0 = vector.load %arg1[%c0, %c0_0] : memref<64x32xf32, #tpu.memory_space<vmem>>, vector<64x32xf32>
    %c0_1 = arith.constant 0 : index
    %c0_2 = arith.constant 0 : index
    %1 = vector.load %arg2[%c0_1, %c0_2] : memref<1x32xf32, #tpu.memory_space<vmem>>, vector<1x32xf32>
    %c0_3 = arith.constant 0 : index
    %c0_4 = arith.constant 0 : index
    %2 = vector.load %arg3[%c0_3, %c0_4] : memref<1x32xf32, #tpu.memory_space<vmem>>, vector<1x32xf32>
    %cst = arith.constant dense<0.000000e+00> : vector<64xf32>
    %3 = vector.multi_reduction <add>, %0, %cst [1] : vector<64x32xf32> to vector<64xf32>
    %4 = vector.shape_cast %3 : vector<64xf32> to vector<64x1xf32>
    %cst_5 = arith.constant 3.200000e+01 : f32
    %5 = vector.broadcast %cst_5 : f32 to vector<64x1xf32>
    %6 = arith.divf %4, %5 : vector<64x1xf32>
    %7 = vector.broadcast %6 : vector<64x1xf32> to vector<64x32xf32>
    %8 = arith.subf %0, %7 : vector<64x32xf32>
    %9 = arith.mulf %8, %8 : vector<64x32xf32>
    %cst_6 = arith.constant dense<0.000000e+00> : vector<64xf32>
    %10 = vector.multi_reduction <add>, %9, %cst_6 [1] : vector<64x32xf32> to vector<64xf32>
    %11 = vector.shape_cast %10 : vector<64xf32> to vector<64x1xf32>
    %cst_7 = arith.constant 3.200000e+01 : f32
    %12 = vector.broadcast %cst_7 : f32 to vector<64x1xf32>
    %13 = arith.divf %11, %12 : vector<64x1xf32>
    %cst_8 = arith.constant 9.99999997E-7 : f32
    %14 = vector.broadcast %cst_8 : f32 to vector<64x1xf32>
    %15 = arith.addf %13, %14 : vector<64x1xf32>
    %16 = math.rsqrt %15 : vector<64x1xf32>
    %17 = vector.broadcast %16 : vector<64x1xf32> to vector<64x32xf32>
    %18 = arith.mulf %8, %17 : vector<64x32xf32>
    %19 = vector.broadcast %1 : vector<1x32xf32> to vector<64x32xf32>
    %20 = arith.mulf %18, %19 : vector<64x32xf32>
    %21 = vector.broadcast %2 : vector<1x32xf32> to vector<64x32xf32>
    %22 = arith.addf %20, %21 : vector<64x32xf32>
    %23 = arith.truncf %22 : vector<64x32xf32> to vector<64x32xbf16>
    %c0_9 = arith.constant 0 : index
    %c0_10 = arith.constant 0 : index
    %24 = vector.load %arg4[%c0_9, %c0_10] : memref<32x32xf32, #tpu.memory_space<vmem>>, vector<32x32xf32>
    %25 = arith.truncf %24 : vector<32x32xf32> to vector<32x32xbf16>
    %cst_11 = arith.constant dense<0.000000e+00> : vector<64x32xf32>
    %26 = tpu.matmul %23, %25, %cst_11 {dimension_numbers = #tpu.dot_dimension_numbers<[1], [0], [0], [1], [0, 0, 1, 1], [], []>} : vector<64x32xbf16>, vector<32x32xbf16>, vector<64x32xf32> -> vector<64x32xf32>
    %c0_12 = arith.constant 0 : index
    %c0_13 = arith.constant 0 : index
    %27 = vector.load %arg5[%c0_12, %c0_13] : memref<1x32xf32, #tpu.memory_space<vmem>>, vector<1x32xf32>
    %28 = vector.broadcast %27 : vector<1x32xf32> to vector<64x32xf32>
    %29 = arith.addf %26, %28 : vector<64x32xf32>
    %30 = arith.truncf %29 : vector<64x32xf32> to vector<64x32xbf16>
    %c0_14 = arith.constant 0 : index
    %c0_15 = arith.constant 0 : index
    %31 = vector.load %arg6[%c0_14, %c0_15] : memref<64x32xbf16, #tpu.memory_space<vmem>>, vector<64x32xbf16>
    tpu.vector_store %arg6[%c0_14, %c0_15], %30 {strides = array<i32>} : memref<64x32xbf16, #tpu.memory_space<vmem>>, vector<64x32xbf16>,
    %c0_16 = arith.constant 0 : index
    %c0_17 = arith.constant 0 : index
    %32 = vector.load %arg7[%c0_16, %c0_17] : memref<64x32xf32, #tpu.memory_space<vmem>>, vector<64x32xf32>
    tpu.vector_store %arg7[%c0_16, %c0_17], %22 {strides = array<i32>} : memref<64x32xf32, #tpu.memory_space<vmem>>, vector<64x32xf32>,
    return
  }
  func.func @transform_0(%arg0: i32) -> (i32, i32) {
    %c0_i32 = arith.constant 0 : i32
    %c0_i32_0 = arith.constant 0 : i32
    return %arg0, %c0_i32 : i32, i32
  }
  func.func @transform_1(%arg0: i32) -> (i32, i32) {
    %c0_i32 = arith.constant 0 : i32
    %c0_i32_0 = arith.constant 0 : i32
    %c0_i32_1 = arith.constant 0 : i32
    return %c0_i32, %c0_i32_0 : i32, i32
  }
  func.func @transform_2(%arg0: i32) -> (i32, i32) {
    %c0_i32 = arith.constant 0 : i32
    %c0_i32_0 = arith.constant 0 : i32
    %c0_i32_1 = arith.constant 0 : i32
    return %c0_i32, %c0_i32_0 : i32, i32
  }
  func.func @transform_3(%arg0: i32) -> (i32, i32) {
    %c0_i32 = arith.constant 0 : i32
    %c0_i32_0 = arith.constant 0 : i32
    %c0_i32_1 = arith.constant 0 : i32
    return %c0_i32, %c0_i32_0 : i32, i32
  }
  func.func @transform_4(%arg0: i32) -> (i32, i32) {
    %c0_i32 = arith.constant 0 : i32
    %c0_i32_0 = arith.constant 0 : i32
    %c0_i32_1 = arith.constant 0 : i32
    return %c0_i32, %c0_i32_0 : i32, i32
  }
  func.func @transform_5(%arg0: i32) -> (i32, i32) {
    %c0_i32 = arith.constant 0 : i32
    %c0_i32_0 = arith.constant 0 : i32
    return %arg0, %c0_i32 : i32, i32
  }
  func.func @transform_6(%arg0: i32) -> (i32, i32) {
    %c0_i32 = arith.constant 0 : i32
    %c0_i32_0 = arith.constant 0 : i32
    return %arg0, %c0_i32 : i32, i32
  }
}

module attributes {stable_mosaic.version = 11 : i64} {
  func.func @_attn_out_kernel(%arg0: i32, %arg1: i32, %arg2: memref<1x32x32xbf16, #tpu.memory_space<vmem>>, %arg3: memref<1x16x64xbf16, #tpu.memory_space<vmem>>, %arg4: memref<1x32x32xf32, #tpu.memory_space<vmem>>, %arg5: memref<32x32xf32, #tpu.memory_space<vmem>>, %arg6: memref<1x32xf32, #tpu.memory_space<vmem>>, %arg7: memref<1x32x32xf32, #tpu.memory_space<vmem>>) attributes {dimension_semantics = [#tpu.dimension_semantics<parallel>, #tpu.dimension_semantics<parallel>], iteration_bounds = array<i64: 2, 2>, scalar_prefetch = 0 : i64, scratch_operands = 0 : i64, tpu.core_type = #tpu.core_type<tc>, window_params = [{transform_indices = @transform_0, window_bounds = array<i64: 1, 32, 32>}, {transform_indices = @transform_1, window_bounds = array<i64: 1, 16, 64>}, {transform_indices = @transform_2, window_bounds = array<i64: 1, 32, 32>}, {pipeline_mode = #tpu.pipeline_mode<synchronous>, transform_indices = @transform_3, window_bounds = array<i64: 32, 32>}, {pipeline_mode = #tpu.pipeline_mode<synchronous>, transform_indices = @transform_4, window_bounds = array<i64: 1, 32>}, {transform_indices = @transform_5, window_bounds = array<i64: 1, 32, 32>}]} {
    %c0 = arith.constant 0 : index
    %c0_0 = arith.constant 0 : index
    %c0_1 = arith.constant 0 : index
    %0 = vector.load %arg2[%c0, %c0_0, %c0_1] : memref<1x32x32xbf16, #tpu.memory_space<vmem>>, vector<1x32x32xbf16>
    %1 = vector.shape_cast %0 : vector<1x32x32xbf16> to vector<32x32xbf16>
    %c0_2 = arith.constant 0 : index
    %c0_3 = arith.constant 0 : index
    %c0_4 = arith.constant 0 : index
    %2 = vector.load %arg3[%c0_2, %c0_3, %c0_4] : memref<1x16x64xbf16, #tpu.memory_space<vmem>>, vector<1x16x64xbf16>
    %3 = vector.shape_cast %2 : vector<1x16x64xbf16> to vector<16x64xbf16>
    %cst = arith.constant 0.000000e+00 : f32
    %4 = vector.broadcast %cst : f32 to vector<32x32xf32>
    %c0_5 = arith.constant 0 : index
    %c0_6 = arith.constant 0 : index
    %5 = vector.load %arg6[%c0_5, %c0_6] : memref<1x32xf32, #tpu.memory_space<vmem>>, vector<1x32xf32>
    %6 = vector.broadcast %5 : vector<1x32xf32> to vector<32x32xf32>
    %7 = arith.addf %4, %6 : vector<32x32xf32>
    %8 = vector.extract_strided_slice %1 {offsets = [0, 0], sizes = [32, 16], strides = [1, 1]} : vector<32x32xbf16> to vector<32x16xbf16>
    %9 = vector.extract_strided_slice %3 {offsets = [0, 0], sizes = [16, 16], strides = [1, 1]} : vector<16x64xbf16> to vector<16x16xbf16>
    %10 = vector.extract_strided_slice %3 {offsets = [0, 32], sizes = [16, 16], strides = [1, 1]} : vector<16x64xbf16> to vector<16x16xbf16>
    %cst_7 = arith.constant dense<0.000000e+00> : vector<32x16xf32>
    %11 = tpu.matmul %8, %9, %cst_7 {dimension_numbers = #tpu.dot_dimension_numbers<[1], [1], [0], [0], [0, 0, 1, 0], [], []>} : vector<32x16xbf16>, vector<16x16xbf16>, vector<32x16xf32> -> vector<32x16xf32>
    %cst_8 = arith.constant dense<0xFF800000> : vector<32xf32>
    %12 = vector.multi_reduction <maximumf>, %11, %cst_8 [1] : vector<32x16xf32> to vector<32xf32>
    %13 = vector.shape_cast %12 : vector<32xf32> to vector<32x1xf32>
    %14 = vector.broadcast %13 : vector<32x1xf32> to vector<32x16xf32>
    %15 = arith.subf %11, %14 : vector<32x16xf32>
    %16 = math.exp %15 : vector<32x16xf32>
    %cst_9 = arith.constant dense<0.000000e+00> : vector<32xf32>
    %17 = vector.multi_reduction <add>, %16, %cst_9 [1] : vector<32x16xf32> to vector<32xf32>
    %18 = vector.shape_cast %17 : vector<32xf32> to vector<32x1xf32>
    %19 = tpu.reciprocal %18 : vector<32x1xf32> -> vector<32x1xf32>
    %20 = vector.broadcast %19 : vector<32x1xf32> to vector<32x16xf32>
    %21 = arith.mulf %16, %20 : vector<32x16xf32>
    %22 = arith.truncf %21 : vector<32x16xf32> to vector<32x16xbf16>
    %cst_10 = arith.constant dense<0.000000e+00> : vector<32x16xf32>
    %23 = tpu.matmul %22, %10, %cst_10 {dimension_numbers = #tpu.dot_dimension_numbers<[1], [0], [0], [1], [0, 0, 1, 1], [], []>} : vector<32x16xbf16>, vector<16x16xbf16>, vector<32x16xf32> -> vector<32x16xf32>
    %24 = arith.truncf %23 : vector<32x16xf32> to vector<32x16xbf16>
    %c0_11 = arith.constant 0 : index
    %c0_12 = arith.constant 0 : index
    %25 = vector.load %arg5[%c0_11, %c0_12] : memref<32x32xf32, #tpu.memory_space<vmem>>, vector<16x32xf32>
    %26 = arith.truncf %25 : vector<16x32xf32> to vector<16x32xbf16>
    %cst_13 = arith.constant dense<0.000000e+00> : vector<32x32xf32>
    %27 = tpu.matmul %24, %26, %cst_13 {dimension_numbers = #tpu.dot_dimension_numbers<[1], [0], [0], [1], [0, 0, 1, 1], [], []>} : vector<32x16xbf16>, vector<16x32xbf16>, vector<32x32xf32> -> vector<32x32xf32>
    %28 = arith.addf %7, %27 : vector<32x32xf32>
    %29 = vector.extract_strided_slice %1 {offsets = [0, 16], sizes = [32, 16], strides = [1, 1]} : vector<32x32xbf16> to vector<32x16xbf16>
    %30 = vector.extract_strided_slice %3 {offsets = [0, 16], sizes = [16, 16], strides = [1, 1]} : vector<16x64xbf16> to vector<16x16xbf16>
    %31 = vector.extract_strided_slice %3 {offsets = [0, 48], sizes = [16, 16], strides = [1, 1]} : vector<16x64xbf16> to vector<16x16xbf16>
    %cst_14 = arith.constant dense<0.000000e+00> : vector<32x16xf32>
    %32 = tpu.matmul %29, %30, %cst_14 {dimension_numbers = #tpu.dot_dimension_numbers<[1], [1], [0], [0], [0, 0, 1, 0], [], []>} : vector<32x16xbf16>, vector<16x16xbf16>, vector<32x16xf32> -> vector<32x16xf32>
    %cst_15 = arith.constant dense<0xFF800000> : vector<32xf32>
    %33 = vector.multi_reduction <maximumf>, %32, %cst_15 [1] : vector<32x16xf32> to vector<32xf32>
    %34 = vector.shape_cast %33 : vector<32xf32> to vector<32x1xf32>
    %35 = vector.broadcast %34 : vector<32x1xf32> to vector<32x16xf32>
    %36 = arith.subf %32, %35 : vector<32x16xf32>
    %37 = math.exp %36 : vector<32x16xf32>
    %cst_16 = arith.constant dense<0.000000e+00> : vector<32xf32>
    %38 = vector.multi_reduction <add>, %37, %cst_16 [1] : vector<32x16xf32> to vector<32xf32>
    %39 = vector.shape_cast %38 : vector<32xf32> to vector<32x1xf32>
    %40 = tpu.reciprocal %39 : vector<32x1xf32> -> vector<32x1xf32>
    %41 = vector.broadcast %40 : vector<32x1xf32> to vector<32x16xf32>
    %42 = arith.mulf %37, %41 : vector<32x16xf32>
    %43 = arith.truncf %42 : vector<32x16xf32> to vector<32x16xbf16>
    %cst_17 = arith.constant dense<0.000000e+00> : vector<32x16xf32>
    %44 = tpu.matmul %43, %31, %cst_17 {dimension_numbers = #tpu.dot_dimension_numbers<[1], [0], [0], [1], [0, 0, 1, 1], [], []>} : vector<32x16xbf16>, vector<16x16xbf16>, vector<32x16xf32> -> vector<32x16xf32>
    %45 = arith.truncf %44 : vector<32x16xf32> to vector<32x16xbf16>
    %c16 = arith.constant 16 : index
    %c0_18 = arith.constant 0 : index
    %46 = vector.load %arg5[%c16, %c0_18] : memref<32x32xf32, #tpu.memory_space<vmem>>, vector<16x32xf32>
    %47 = arith.truncf %46 : vector<16x32xf32> to vector<16x32xbf16>
    %cst_19 = arith.constant dense<0.000000e+00> : vector<32x32xf32>
    %48 = tpu.matmul %45, %47, %cst_19 {dimension_numbers = #tpu.dot_dimension_numbers<[1], [0], [0], [1], [0, 0, 1, 1], [], []>} : vector<32x16xbf16>, vector<16x32xbf16>, vector<32x32xf32> -> vector<32x32xf32>
    %49 = arith.addf %28, %48 : vector<32x32xf32>
    %c0_20 = arith.constant 0 : index
    %c0_21 = arith.constant 0 : index
    %c0_22 = arith.constant 0 : index
    %50 = vector.load %arg4[%c0_20, %c0_21, %c0_22] : memref<1x32x32xf32, #tpu.memory_space<vmem>>, vector<1x32x32xf32>
    %51 = vector.shape_cast %50 : vector<1x32x32xf32> to vector<32x32xf32>
    %52 = arith.addf %49, %51 : vector<32x32xf32>
    %c0_23 = arith.constant 0 : index
    %c0_24 = arith.constant 0 : index
    %c0_25 = arith.constant 0 : index
    %53 = vector.load %arg7[%c0_23, %c0_24, %c0_25] : memref<1x32x32xf32, #tpu.memory_space<vmem>>, vector<1x32x32xf32>
    %54 = vector.shape_cast %53 : vector<1x32x32xf32> to vector<32x32xf32>
    %55 = vector.shape_cast %52 : vector<32x32xf32> to vector<1x32x32xf32>
    tpu.vector_store %arg7[%c0_23, %c0_24, %c0_25], %55 {strides = array<i32>} : memref<1x32x32xf32, #tpu.memory_space<vmem>>, vector<1x32x32xf32>,
    return
  }
  func.func @transform_0(%arg0: i32, %arg1: i32) -> (i32, i32, i32) {
    %c0_i32 = arith.constant 0 : i32
    %c0_i32_0 = arith.constant 0 : i32
    return %arg0, %arg1, %c0_i32 : i32, i32, i32
  }
  func.func @transform_1(%arg0: i32, %arg1: i32) -> (i32, i32, i32) {
    %c0_i32 = arith.constant 0 : i32
    %c0_i32_0 = arith.constant 0 : i32
    %c0_i32_1 = arith.constant 0 : i32
    return %arg0, %c0_i32, %c0_i32_0 : i32, i32, i32
  }
  func.func @transform_2(%arg0: i32, %arg1: i32) -> (i32, i32, i32) {
    %c0_i32 = arith.constant 0 : i32
    %c0_i32_0 = arith.constant 0 : i32
    return %arg0, %arg1, %c0_i32 : i32, i32, i32
  }
  func.func @transform_3(%arg0: i32, %arg1: i32) -> (i32, i32) {
    %c0_i32 = arith.constant 0 : i32
    %c0_i32_0 = arith.constant 0 : i32
    %c0_i32_1 = arith.constant 0 : i32
    return %c0_i32, %c0_i32_0 : i32, i32
  }
  func.func @transform_4(%arg0: i32, %arg1: i32) -> (i32, i32) {
    %c0_i32 = arith.constant 0 : i32
    %c0_i32_0 = arith.constant 0 : i32
    %c0_i32_1 = arith.constant 0 : i32
    return %c0_i32, %c0_i32_0 : i32, i32
  }
  func.func @transform_5(%arg0: i32, %arg1: i32) -> (i32, i32, i32) {
    %c0_i32 = arith.constant 0 : i32
    %c0_i32_0 = arith.constant 0 : i32
    return %arg0, %arg1, %c0_i32 : i32, i32, i32
  }
}

module attributes {stable_mosaic.version = 11 : i64} {
  func.func @_sr_ln_kv_kernel(%arg0: i32, %arg1: memref<16x128xf32, #tpu.memory_space<vmem>>, %arg2: memref<128x32xf32, #tpu.memory_space<vmem>>, %arg3: memref<1x32xf32, #tpu.memory_space<vmem>>, %arg4: memref<1x32xf32, #tpu.memory_space<vmem>>, %arg5: memref<1x32xf32, #tpu.memory_space<vmem>>, %arg6: memref<32x64xf32, #tpu.memory_space<vmem>>, %arg7: memref<1x64xf32, #tpu.memory_space<vmem>>, %arg8: memref<16x64xbf16, #tpu.memory_space<vmem>>) attributes {dimension_semantics = [#tpu.dimension_semantics<parallel>], iteration_bounds = array<i64: 2>, scalar_prefetch = 0 : i64, scratch_operands = 0 : i64, tpu.core_type = #tpu.core_type<tc>, window_params = [{transform_indices = @transform_0, window_bounds = array<i64: 16, 128>}, {pipeline_mode = #tpu.pipeline_mode<synchronous>, transform_indices = @transform_1, window_bounds = array<i64: 128, 32>}, {pipeline_mode = #tpu.pipeline_mode<synchronous>, transform_indices = @transform_2, window_bounds = array<i64: 1, 32>}, {pipeline_mode = #tpu.pipeline_mode<synchronous>, transform_indices = @transform_3, window_bounds = array<i64: 1, 32>}, {pipeline_mode = #tpu.pipeline_mode<synchronous>, transform_indices = @transform_4, window_bounds = array<i64: 1, 32>}, {pipeline_mode = #tpu.pipeline_mode<synchronous>, transform_indices = @transform_5, window_bounds = array<i64: 32, 64>}, {pipeline_mode = #tpu.pipeline_mode<synchronous>, transform_indices = @transform_6, window_bounds = array<i64: 1, 64>}, {transform_indices = @transform_7, window_bounds = array<i64: 16, 64>}]} {
    %c0 = arith.constant 0 : index
    %c0_0 = arith.constant 0 : index
    %0 = vector.load %arg1[%c0, %c0_0] : memref<16x128xf32, #tpu.memory_space<vmem>>, vector<16x128xf32>
    %1 = arith.truncf %0 : vector<16x128xf32> to vector<16x128xbf16>
    %c0_1 = arith.constant 0 : index
    %c0_2 = arith.constant 0 : index
    %2 = vector.load %arg2[%c0_1, %c0_2] : memref<128x32xf32, #tpu.memory_space<vmem>>, vector<128x32xf32>
    %3 = arith.truncf %2 : vector<128x32xf32> to vector<128x32xbf16>
    %cst = arith.constant dense<0.000000e+00> : vector<16x32xf32>
    %4 = tpu.matmul %1, %3, %cst {dimension_numbers = #tpu.dot_dimension_numbers<[1], [0], [0], [1], [0, 0, 1, 1], [], []>} : vector<16x128xbf16>, vector<128x32xbf16>, vector<16x32xf32> -> vector<16x32xf32>
    %c0_3 = arith.constant 0 : index
    %c0_4 = arith.constant 0 : index
    %5 = vector.load %arg3[%c0_3, %c0_4] : memref<1x32xf32, #tpu.memory_space<vmem>>, vector<1x32xf32>
    %6 = vector.broadcast %5 : vector<1x32xf32> to vector<16x32xf32>
    %7 = arith.addf %4, %6 : vector<16x32xf32>
    %c0_5 = arith.constant 0 : index
    %c0_6 = arith.constant 0 : index
    %8 = vector.load %arg4[%c0_5, %c0_6] : memref<1x32xf32, #tpu.memory_space<vmem>>, vector<1x32xf32>
    %c0_7 = arith.constant 0 : index
    %c0_8 = arith.constant 0 : index
    %9 = vector.load %arg5[%c0_7, %c0_8] : memref<1x32xf32, #tpu.memory_space<vmem>>, vector<1x32xf32>
    %cst_9 = arith.constant dense<0.000000e+00> : vector<16xf32>
    %10 = vector.multi_reduction <add>, %7, %cst_9 [1] : vector<16x32xf32> to vector<16xf32>
    %11 = vector.shape_cast %10 : vector<16xf32> to vector<16x1xf32>
    %cst_10 = arith.constant 3.200000e+01 : f32
    %12 = vector.broadcast %cst_10 : f32 to vector<16x1xf32>
    %13 = arith.divf %11, %12 : vector<16x1xf32>
    %14 = vector.broadcast %13 : vector<16x1xf32> to vector<16x32xf32>
    %15 = arith.subf %7, %14 : vector<16x32xf32>
    %16 = arith.mulf %15, %15 : vector<16x32xf32>
    %cst_11 = arith.constant dense<0.000000e+00> : vector<16xf32>
    %17 = vector.multi_reduction <add>, %16, %cst_11 [1] : vector<16x32xf32> to vector<16xf32>
    %18 = vector.shape_cast %17 : vector<16xf32> to vector<16x1xf32>
    %cst_12 = arith.constant 3.200000e+01 : f32
    %19 = vector.broadcast %cst_12 : f32 to vector<16x1xf32>
    %20 = arith.divf %18, %19 : vector<16x1xf32>
    %cst_13 = arith.constant 9.99999997E-7 : f32
    %21 = vector.broadcast %cst_13 : f32 to vector<16x1xf32>
    %22 = arith.addf %20, %21 : vector<16x1xf32>
    %23 = math.rsqrt %22 : vector<16x1xf32>
    %24 = vector.broadcast %23 : vector<16x1xf32> to vector<16x32xf32>
    %25 = arith.mulf %15, %24 : vector<16x32xf32>
    %26 = vector.broadcast %8 : vector<1x32xf32> to vector<16x32xf32>
    %27 = arith.mulf %25, %26 : vector<16x32xf32>
    %28 = vector.broadcast %9 : vector<1x32xf32> to vector<16x32xf32>
    %29 = arith.addf %27, %28 : vector<16x32xf32>
    %30 = arith.truncf %29 : vector<16x32xf32> to vector<16x32xbf16>
    %c0_14 = arith.constant 0 : index
    %c0_15 = arith.constant 0 : index
    %31 = vector.load %arg6[%c0_14, %c0_15] : memref<32x64xf32, #tpu.memory_space<vmem>>, vector<32x64xf32>
    %32 = arith.truncf %31 : vector<32x64xf32> to vector<32x64xbf16>
    %cst_16 = arith.constant dense<0.000000e+00> : vector<16x64xf32>
    %33 = tpu.matmul %30, %32, %cst_16 {dimension_numbers = #tpu.dot_dimension_numbers<[1], [0], [0], [1], [0, 0, 1, 1], [], []>} : vector<16x32xbf16>, vector<32x64xbf16>, vector<16x64xf32> -> vector<16x64xf32>
    %c0_17 = arith.constant 0 : index
    %c0_18 = arith.constant 0 : index
    %34 = vector.load %arg7[%c0_17, %c0_18] : memref<1x64xf32, #tpu.memory_space<vmem>>, vector<1x64xf32>
    %35 = vector.broadcast %34 : vector<1x64xf32> to vector<16x64xf32>
    %36 = arith.addf %33, %35 : vector<16x64xf32>
    %37 = arith.truncf %36 : vector<16x64xf32> to vector<16x64xbf16>
    %c0_19 = arith.constant 0 : index
    %c0_20 = arith.constant 0 : index
    %38 = vector.load %arg8[%c0_19, %c0_20] : memref<16x64xbf16, #tpu.memory_space<vmem>>, vector<16x64xbf16>
    tpu.vector_store %arg8[%c0_19, %c0_20], %37 {strides = array<i32>} : memref<16x64xbf16, #tpu.memory_space<vmem>>, vector<16x64xbf16>,
    return
  }
  func.func @transform_0(%arg0: i32) -> (i32, i32) {
    %c0_i32 = arith.constant 0 : i32
    %c0_i32_0 = arith.constant 0 : i32
    return %arg0, %c0_i32 : i32, i32
  }
  func.func @transform_1(%arg0: i32) -> (i32, i32) {
    %c0_i32 = arith.constant 0 : i32
    %c0_i32_0 = arith.constant 0 : i32
    %c0_i32_1 = arith.constant 0 : i32
    return %c0_i32, %c0_i32_0 : i32, i32
  }
  func.func @transform_2(%arg0: i32) -> (i32, i32) {
    %c0_i32 = arith.constant 0 : i32
    %c0_i32_0 = arith.constant 0 : i32
    %c0_i32_1 = arith.constant 0 : i32
    return %c0_i32, %c0_i32_0 : i32, i32
  }
  func.func @transform_3(%arg0: i32) -> (i32, i32) {
    %c0_i32 = arith.constant 0 : i32
    %c0_i32_0 = arith.constant 0 : i32
    %c0_i32_1 = arith.constant 0 : i32
    return %c0_i32, %c0_i32_0 : i32, i32
  }
  func.func @transform_4(%arg0: i32) -> (i32, i32) {
    %c0_i32 = arith.constant 0 : i32
    %c0_i32_0 = arith.constant 0 : i32
    %c0_i32_1 = arith.constant 0 : i32
    return %c0_i32, %c0_i32_0 : i32, i32
  }
  func.func @transform_5(%arg0: i32) -> (i32, i32) {
    %c0_i32 = arith.constant 0 : i32
    %c0_i32_0 = arith.constant 0 : i32
    %c0_i32_1 = arith.constant 0 : i32
    return %c0_i32, %c0_i32_0 : i32, i32
  }
  func.func @transform_6(%arg0: i32) -> (i32, i32) {
    %c0_i32 = arith.constant 0 : i32
    %c0_i32_0 = arith.constant 0 : i32
    %c0_i32_1 = arith.constant 0 : i32
    return %c0_i32, %c0_i32_0 : i32, i32
  }
  func.func @transform_7(%arg0: i32) -> (i32, i32) {
    %c0_i32 = arith.constant 0 : i32
    %c0_i32_0 = arith.constant 0 : i32
    return %arg0, %c0_i32 : i32, i32
  }
}

module attributes {stable_mosaic.version = 11 : i64} {
  func.func @_ffn_kernel(%arg0: i32, %arg1: i32, %arg2: memref<1x32x32xf32, #tpu.memory_space<vmem>>, %arg3: memref<1x8x32xf32, #tpu.memory_space<vmem>>, %arg4: memref<1x8x32xf32, #tpu.memory_space<vmem>>, %arg5: memref<1x32xf32, #tpu.memory_space<vmem>>, %arg6: memref<1x32xf32, #tpu.memory_space<vmem>>, %arg7: memref<32x128xf32, #tpu.memory_space<vmem>>, %arg8: memref<1x128xf32, #tpu.memory_space<vmem>>, %arg9: memref<9x128xf32, #tpu.memory_space<vmem>>, %arg10: memref<1x128xf32, #tpu.memory_space<vmem>>, %arg11: memref<128x32xf32, #tpu.memory_space<vmem>>, %arg12: memref<1x32xf32, #tpu.memory_space<vmem>>, %arg13: memref<1x32x32xf32, #tpu.memory_space<vmem>>) attributes {dimension_semantics = [#tpu.dimension_semantics<parallel>, #tpu.dimension_semantics<parallel>], iteration_bounds = array<i64: 2, 2>, scalar_prefetch = 0 : i64, scratch_operands = 0 : i64, tpu.core_type = #tpu.core_type<tc>, window_params = [{transform_indices = @transform_0, window_bounds = array<i64: 1, 32, 32>}, {transform_indices = @transform_1, window_bounds = array<i64: 1, 8, 32>}, {transform_indices = @transform_2, window_bounds = array<i64: 1, 8, 32>}, {pipeline_mode = #tpu.pipeline_mode<synchronous>, transform_indices = @transform_3, window_bounds = array<i64: 1, 32>}, {pipeline_mode = #tpu.pipeline_mode<synchronous>, transform_indices = @transform_4, window_bounds = array<i64: 1, 32>}, {pipeline_mode = #tpu.pipeline_mode<synchronous>, transform_indices = @transform_5, window_bounds = array<i64: 32, 128>}, {pipeline_mode = #tpu.pipeline_mode<synchronous>, transform_indices = @transform_6, window_bounds = array<i64: 1, 128>}, {pipeline_mode = #tpu.pipeline_mode<synchronous>, transform_indices = @transform_7, window_bounds = array<i64: 9, 128>}, {pipeline_mode = #tpu.pipeline_mode<synchronous>, transform_indices = @transform_8, window_bounds = array<i64: 1, 128>}, {pipeline_mode = #tpu.pipeline_mode<synchronous>, transform_indices = @transform_9, window_bounds = array<i64: 128, 32>}, {pipeline_mode = #tpu.pipeline_mode<synchronous>, transform_indices = @transform_10, window_bounds = array<i64: 1, 32>}, {transform_indices = @transform_11, window_bounds = array<i64: 1, 32, 32>}]} {
    %c0 = arith.constant 0 : index
    %c0_0 = arith.constant 0 : index
    %0 = vector.load %arg5[%c0, %c0_0] : memref<1x32xf32, #tpu.memory_space<vmem>>, vector<1x32xf32>
    %c0_1 = arith.constant 0 : index
    %c0_2 = arith.constant 0 : index
    %1 = vector.load %arg6[%c0_1, %c0_2] : memref<1x32xf32, #tpu.memory_space<vmem>>, vector<1x32xf32>
    %c0_3 = arith.constant 0 : index
    %c0_4 = arith.constant 0 : index
    %2 = vector.load %arg7[%c0_3, %c0_4] : memref<32x128xf32, #tpu.memory_space<vmem>>, vector<32x128xf32>
    %3 = arith.truncf %2 : vector<32x128xf32> to vector<32x128xbf16>
    %c0_5 = arith.constant 0 : index
    %c0_6 = arith.constant 0 : index
    %4 = vector.load %arg8[%c0_5, %c0_6] : memref<1x128xf32, #tpu.memory_space<vmem>>, vector<1x128xf32>
    %c0_7 = arith.constant 0 : index
    %c0_8 = arith.constant 0 : index
    %c0_9 = arith.constant 0 : index
    %5 = vector.load %arg2[%c0_7, %c0_8, %c0_9] : memref<1x32x32xf32, #tpu.memory_space<vmem>>, vector<1x32x32xf32>
    %6 = vector.shape_cast %5 : vector<1x32x32xf32> to vector<32x32xf32>
    %cst = arith.constant dense<0.000000e+00> : vector<32xf32>
    %7 = vector.multi_reduction <add>, %6, %cst [1] : vector<32x32xf32> to vector<32xf32>
    %8 = vector.shape_cast %7 : vector<32xf32> to vector<32x1xf32>
    %cst_10 = arith.constant 3.200000e+01 : f32
    %9 = vector.broadcast %cst_10 : f32 to vector<32x1xf32>
    %10 = arith.divf %8, %9 : vector<32x1xf32>
    %11 = vector.broadcast %10 : vector<32x1xf32> to vector<32x32xf32>
    %12 = arith.subf %6, %11 : vector<32x32xf32>
    %13 = arith.mulf %12, %12 : vector<32x32xf32>
    %cst_11 = arith.constant dense<0.000000e+00> : vector<32xf32>
    %14 = vector.multi_reduction <add>, %13, %cst_11 [1] : vector<32x32xf32> to vector<32xf32>
    %15 = vector.shape_cast %14 : vector<32xf32> to vector<32x1xf32>
    %cst_12 = arith.constant 3.200000e+01 : f32
    %16 = vector.broadcast %cst_12 : f32 to vector<32x1xf32>
    %17 = arith.divf %15, %16 : vector<32x1xf32>
    %cst_13 = arith.constant 9.99999997E-7 : f32
    %18 = vector.broadcast %cst_13 : f32 to vector<32x1xf32>
    %19 = arith.addf %17, %18 : vector<32x1xf32>
    %20 = math.rsqrt %19 : vector<32x1xf32>
    %21 = vector.broadcast %20 : vector<32x1xf32> to vector<32x32xf32>
    %22 = arith.mulf %12, %21 : vector<32x32xf32>
    %23 = vector.broadcast %0 : vector<1x32xf32> to vector<32x32xf32>
    %24 = arith.mulf %22, %23 : vector<32x32xf32>
    %25 = vector.broadcast %1 : vector<1x32xf32> to vector<32x32xf32>
    %26 = arith.addf %24, %25 : vector<32x32xf32>
    %27 = arith.truncf %26 : vector<32x32xf32> to vector<32x32xbf16>
    %cst_14 = arith.constant dense<0.000000e+00> : vector<32x128xf32>
    %28 = tpu.matmul %27, %3, %cst_14 {dimension_numbers = #tpu.dot_dimension_numbers<[1], [0], [0], [1], [0, 0, 1, 1], [], []>} : vector<32x32xbf16>, vector<32x128xbf16>, vector<32x128xf32> -> vector<32x128xf32>
    %29 = vector.broadcast %4 : vector<1x128xf32> to vector<32x128xf32>
    %30 = arith.addf %28, %29 : vector<32x128xf32>
    %c0_15 = arith.constant 0 : index
    %c0_16 = arith.constant 0 : index
    %c0_17 = arith.constant 0 : index
    %31 = vector.load %arg3[%c0_15, %c0_16, %c0_17] : memref<1x8x32xf32, #tpu.memory_space<vmem>>, vector<1x8x32xf32>
    %32 = vector.shape_cast %31 : vector<1x8x32xf32> to vector<8x32xf32>
    %cst_18 = arith.constant dense<0.000000e+00> : vector<8xf32>
    %33 = vector.multi_reduction <add>, %32, %cst_18 [1] : vector<8x32xf32> to vector<8xf32>
    %34 = vector.shape_cast %33 : vector<8xf32> to vector<8x1xf32>
    %cst_19 = arith.constant 3.200000e+01 : f32
    %35 = vector.broadcast %cst_19 : f32 to vector<8x1xf32>
    %36 = arith.divf %34, %35 : vector<8x1xf32>
    %37 = vector.broadcast %36 : vector<8x1xf32> to vector<8x32xf32>
    %38 = arith.subf %32, %37 : vector<8x32xf32>
    %39 = arith.mulf %38, %38 : vector<8x32xf32>
    %cst_20 = arith.constant dense<0.000000e+00> : vector<8xf32>
    %40 = vector.multi_reduction <add>, %39, %cst_20 [1] : vector<8x32xf32> to vector<8xf32>
    %41 = vector.shape_cast %40 : vector<8xf32> to vector<8x1xf32>
    %cst_21 = arith.constant 3.200000e+01 : f32
    %42 = vector.broadcast %cst_21 : f32 to vector<8x1xf32>
    %43 = arith.divf %41, %42 : vector<8x1xf32>
    %cst_22 = arith.constant 9.99999997E-7 : f32
    %44 = vector.broadcast %cst_22 : f32 to vector<8x1xf32>
    %45 = arith.addf %43, %44 : vector<8x1xf32>
    %46 = math.rsqrt %45 : vector<8x1xf32>
    %47 = vector.broadcast %46 : vector<8x1xf32> to vector<8x32xf32>
    %48 = arith.mulf %38, %47 : vector<8x32xf32>
    %49 = vector.broadcast %0 : vector<1x32xf32> to vector<8x32xf32>
    %50 = arith.mulf %48, %49 : vector<8x32xf32>
    %51 = vector.broadcast %1 : vector<1x32xf32> to vector<8x32xf32>
    %52 = arith.addf %50, %51 : vector<8x32xf32>
    %53 = arith.truncf %52 : vector<8x32xf32> to vector<8x32xbf16>
    %cst_23 = arith.constant dense<0.000000e+00> : vector<8x128xf32>
    %54 = tpu.matmul %53, %3, %cst_23 {dimension_numbers = #tpu.dot_dimension_numbers<[1], [0], [0], [1], [0, 0, 1, 1], [], []>} : vector<8x32xbf16>, vector<32x128xbf16>, vector<8x128xf32> -> vector<8x128xf32>
    %55 = vector.broadcast %4 : vector<1x128xf32> to vector<8x128xf32>
    %56 = arith.addf %54, %55 : vector<8x128xf32>
    %c0_24 = arith.constant 0 : index
    %c0_25 = arith.constant 0 : index
    %c0_26 = arith.constant 0 : index
    %57 = vector.load %arg4[%c0_24, %c0_25, %c0_26] : memref<1x8x32xf32, #tpu.memory_space<vmem>>, vector<1x8x32xf32>
    %58 = vector.shape_cast %57 : vector<1x8x32xf32> to vector<8x32xf32>
    %cst_27 = arith.constant dense<0.000000e+00> : vector<8xf32>
    %59 = vector.multi_reduction <add>, %58, %cst_27 [1] : vector<8x32xf32> to vector<8xf32>
    %60 = vector.shape_cast %59 : vector<8xf32> to vector<8x1xf32>
    %cst_28 = arith.constant 3.200000e+01 : f32
    %61 = vector.broadcast %cst_28 : f32 to vector<8x1xf32>
    %62 = arith.divf %60, %61 : vector<8x1xf32>
    %63 = vector.broadcast %62 : vector<8x1xf32> to vector<8x32xf32>
    %64 = arith.subf %58, %63 : vector<8x32xf32>
    %65 = arith.mulf %64, %64 : vector<8x32xf32>
    %cst_29 = arith.constant dense<0.000000e+00> : vector<8xf32>
    %66 = vector.multi_reduction <add>, %65, %cst_29 [1] : vector<8x32xf32> to vector<8xf32>
    %67 = vector.shape_cast %66 : vector<8xf32> to vector<8x1xf32>
    %cst_30 = arith.constant 3.200000e+01 : f32
    %68 = vector.broadcast %cst_30 : f32 to vector<8x1xf32>
    %69 = arith.divf %67, %68 : vector<8x1xf32>
    %cst_31 = arith.constant 9.99999997E-7 : f32
    %70 = vector.broadcast %cst_31 : f32 to vector<8x1xf32>
    %71 = arith.addf %69, %70 : vector<8x1xf32>
    %72 = math.rsqrt %71 : vector<8x1xf32>
    %73 = vector.broadcast %72 : vector<8x1xf32> to vector<8x32xf32>
    %74 = arith.mulf %64, %73 : vector<8x32xf32>
    %75 = vector.broadcast %0 : vector<1x32xf32> to vector<8x32xf32>
    %76 = arith.mulf %74, %75 : vector<8x32xf32>
    %77 = vector.broadcast %1 : vector<1x32xf32> to vector<8x32xf32>
    %78 = arith.addf %76, %77 : vector<8x32xf32>
    %79 = arith.truncf %78 : vector<8x32xf32> to vector<8x32xbf16>
    %cst_32 = arith.constant dense<0.000000e+00> : vector<8x128xf32>
    %80 = tpu.matmul %79, %3, %cst_32 {dimension_numbers = #tpu.dot_dimension_numbers<[1], [0], [0], [1], [0, 0, 1, 1], [], []>} : vector<8x32xbf16>, vector<32x128xbf16>, vector<8x128xf32> -> vector<8x128xf32>
    %81 = vector.broadcast %4 : vector<1x128xf32> to vector<8x128xf32>
    %82 = arith.addf %80, %81 : vector<8x128xf32>
    %c0_i32 = arith.constant 0 : i32
    %83 = arith.cmpi sgt, %arg1, %c0_i32 : i32
    %cst_33 = arith.constant 0.000000e+00 : f32
    %84 = vector.broadcast %cst_33 : f32 to vector<8x128xf32>
    %85 = arith.select %83, %56, %84 : vector<8x128xf32>
    %c1_i32 = arith.constant 1 : i32
    %86 = arith.cmpi slt, %arg1, %c1_i32 : i32
    %cst_34 = arith.constant 0.000000e+00 : f32
    %87 = vector.broadcast %cst_34 : f32 to vector<8x128xf32>
    %88 = arith.select %86, %82, %87 : vector<8x128xf32>
    %89 = tpu.concatenate %85, %30, %88 in 0 : vector<8x128xf32>, vector<32x128xf32>, vector<8x128xf32> -> vector<48x128xf32>
    %90 = tpu.iota {dimensions = array<i32: 0>} : vector<48x1xi32>
    %c8_i32 = arith.constant 8 : i32
    %c0_i32_35 = arith.constant 0 : i32
    %91 = arith.cmpi eq, %c8_i32, %c0_i32_35 : i32
    %c1_i32_36 = arith.constant 1 : i32
    %92 = arith.select %91, %c1_i32_36, %c8_i32 : i32
    %93 = vector.broadcast %92 : i32 to vector<48x1xi32>
    %94 = arith.remsi %90, %93 : vector<48x1xi32>
    %c0_i32_37 = arith.constant 0 : i32
    %95 = vector.broadcast %c0_i32_37 : i32 to vector<48x1xi32>
    %96 = arith.cmpi ne, %94, %95 : vector<48x1xi32>
    %c0_i32_38 = arith.constant 0 : i32
    %97 = vector.broadcast %c0_i32_38 : i32 to vector<48x1xi32>
    %98 = arith.cmpi slt, %94, %97 : vector<48x1xi32>
    %c0_i32_39 = arith.constant 0 : i32
    %99 = arith.cmpi slt, %92, %c0_i32_39 : i32
    %100 = vector.broadcast %99 : i1 to vector<48x1xi1>
    %101 = vector.broadcast %100 : vector<48x1xi1> to vector<48x1xi1>
    %102 = arith.xori %98, %101 : vector<48x1xi1>
    %103 = arith.andi %102, %96 : vector<48x1xi1>
    %104 = vector.broadcast %92 : i32 to vector<48x1xi32>
    %105 = arith.addi %94, %104 : vector<48x1xi32>
    %106 = arith.select %103, %105, %94 : vector<48x1xi1>, vector<48x1xi32>
    %c0_i32_40 = arith.constant 0 : i32
    %107 = vector.broadcast %c0_i32_40 : i32 to vector<48x1xi32>
    %108 = arith.cmpi sgt, %106, %107 : vector<48x1xi32>
    %c7_i32 = arith.constant 7 : i32
    %109 = vector.broadcast %c7_i32 : i32 to vector<48x1xi32>
    %110 = arith.cmpi slt, %106, %109 : vector<48x1xi32>
    %c0_41 = arith.constant 0 : index
    %c0_42 = arith.constant 0 : index
    %111 = vector.load %arg9[%c0_41, %c0_42] : memref<9x128xf32, #tpu.memory_space<vmem>>, vector<9x128xf32>
    %112 = vector.extract_strided_slice %111 {offsets = [4, 0], sizes = [1, 128], strides = [1, 1]} : vector<9x128xf32> to vector<1x128xf32>
    %113 = vector.broadcast %112 : vector<1x128xf32> to vector<48x128xf32>
    %114 = arith.mulf %89, %113 : vector<48x128xf32>
    %c9_i32 = arith.constant 9 : i32
    %115 = tpu.dynamic_rotate %89 by %c9_i32 dim 0 : vector<48x128xf32>, i32 -> vector<48x128xf32>
    %cst_43 = arith.constant 0.000000e+00 : f32
    %116 = vector.shape_cast %108 : vector<48x1xi1> to vector<48x1xi1>
    %117 = vector.broadcast %116 : vector<48x1xi1> to vector<48x128xi1>
    %118 = vector.broadcast %cst_43 : f32 to vector<48x128xf32>
    %119 = arith.select %117, %115, %118 : vector<48x128xi1>, vector<48x128xf32>
    %120 = vector.extract_strided_slice %111 {offsets = [0, 0], sizes = [1, 128], strides = [1, 1]} : vector<9x128xf32> to vector<1x128xf32>
    %121 = vector.broadcast %120 : vector<1x128xf32> to vector<48x128xf32>
    %122 = arith.mulf %119, %121 : vector<48x128xf32>
    %123 = arith.addf %114, %122 : vector<48x128xf32>
    %c8_i32_44 = arith.constant 8 : i32
    %124 = tpu.dynamic_rotate %89 by %c8_i32_44 dim 0 : vector<48x128xf32>, i32 -> vector<48x128xf32>
    %125 = vector.extract_strided_slice %111 {offsets = [1, 0], sizes = [1, 128], strides = [1, 1]} : vector<9x128xf32> to vector<1x128xf32>
    %126 = vector.broadcast %125 : vector<1x128xf32> to vector<48x128xf32>
    %127 = arith.mulf %124, %126 : vector<48x128xf32>
    %128 = arith.addf %123, %127 : vector<48x128xf32>
    %c7_i32_45 = arith.constant 7 : i32
    %129 = tpu.dynamic_rotate %89 by %c7_i32_45 dim 0 : vector<48x128xf32>, i32 -> vector<48x128xf32>
    %cst_46 = arith.constant 0.000000e+00 : f32
    %130 = vector.shape_cast %110 : vector<48x1xi1> to vector<48x1xi1>
    %131 = vector.broadcast %130 : vector<48x1xi1> to vector<48x128xi1>
    %132 = vector.broadcast %cst_46 : f32 to vector<48x128xf32>
    %133 = arith.select %131, %129, %132 : vector<48x128xi1>, vector<48x128xf32>
    %134 = vector.extract_strided_slice %111 {offsets = [2, 0], sizes = [1, 128], strides = [1, 1]} : vector<9x128xf32> to vector<1x128xf32>
    %135 = vector.broadcast %134 : vector<1x128xf32> to vector<48x128xf32>
    %136 = arith.mulf %133, %135 : vector<48x128xf32>
    %137 = arith.addf %128, %136 : vector<48x128xf32>
    %c1_i32_47 = arith.constant 1 : i32
    %138 = tpu.dynamic_rotate %89 by %c1_i32_47 dim 0 : vector<48x128xf32>, i32 -> vector<48x128xf32>
    %cst_48 = arith.constant 0.000000e+00 : f32
    %139 = vector.shape_cast %108 : vector<48x1xi1> to vector<48x1xi1>
    %140 = vector.broadcast %139 : vector<48x1xi1> to vector<48x128xi1>
    %141 = vector.broadcast %cst_48 : f32 to vector<48x128xf32>
    %142 = arith.select %140, %138, %141 : vector<48x128xi1>, vector<48x128xf32>
    %143 = vector.extract_strided_slice %111 {offsets = [3, 0], sizes = [1, 128], strides = [1, 1]} : vector<9x128xf32> to vector<1x128xf32>
    %144 = vector.broadcast %143 : vector<1x128xf32> to vector<48x128xf32>
    %145 = arith.mulf %142, %144 : vector<48x128xf32>
    %146 = arith.addf %137, %145 : vector<48x128xf32>
    %c47_i32 = arith.constant 47 : i32
    %147 = tpu.dynamic_rotate %89 by %c47_i32 dim 0 : vector<48x128xf32>, i32 -> vector<48x128xf32>
    %cst_49 = arith.constant 0.000000e+00 : f32
    %148 = vector.shape_cast %110 : vector<48x1xi1> to vector<48x1xi1>
    %149 = vector.broadcast %148 : vector<48x1xi1> to vector<48x128xi1>
    %150 = vector.broadcast %cst_49 : f32 to vector<48x128xf32>
    %151 = arith.select %149, %147, %150 : vector<48x128xi1>, vector<48x128xf32>
    %152 = vector.extract_strided_slice %111 {offsets = [5, 0], sizes = [1, 128], strides = [1, 1]} : vector<9x128xf32> to vector<1x128xf32>
    %153 = vector.broadcast %152 : vector<1x128xf32> to vector<48x128xf32>
    %154 = arith.mulf %151, %153 : vector<48x128xf32>
    %155 = arith.addf %146, %154 : vector<48x128xf32>
    %c41_i32 = arith.constant 41 : i32
    %156 = tpu.dynamic_rotate %89 by %c41_i32 dim 0 : vector<48x128xf32>, i32 -> vector<48x128xf32>
    %cst_50 = arith.constant 0.000000e+00 : f32
    %157 = vector.shape_cast %108 : vector<48x1xi1> to vector<48x1xi1>
    %158 = vector.broadcast %157 : vector<48x1xi1> to vector<48x128xi1>
    %159 = vector.broadcast %cst_50 : f32 to vector<48x128xf32>
    %160 = arith.select %158, %156, %159 : vector<48x128xi1>, vector<48x128xf32>
    %161 = vector.extract_strided_slice %111 {offsets = [6, 0], sizes = [1, 128], strides = [1, 1]} : vector<9x128xf32> to vector<1x128xf32>
    %162 = vector.broadcast %161 : vector<1x128xf32> to vector<48x128xf32>
    %163 = arith.mulf %160, %162 : vector<48x128xf32>
    %164 = arith.addf %155, %163 : vector<48x128xf32>
    %c40_i32 = arith.constant 40 : i32
    %165 = tpu.dynamic_rotate %89 by %c40_i32 dim 0 : vector<48x128xf32>, i32 -> vector<48x128xf32>
    %166 = vector.extract_strided_slice %111 {offsets = [7, 0], sizes = [1, 128], strides = [1, 1]} : vector<9x128xf32> to vector<1x128xf32>
    %167 = vector.broadcast %166 : vector<1x128xf32> to vector<48x128xf32>
    %168 = arith.mulf %165, %167 : vector<48x128xf32>
    %169 = arith.addf %164, %168 : vector<48x128xf32>
    %c39_i32 = arith.constant 39 : i32
    %170 = tpu.dynamic_rotate %89 by %c39_i32 dim 0 : vector<48x128xf32>, i32 -> vector<48x128xf32>
    %cst_51 = arith.constant 0.000000e+00 : f32
    %171 = vector.shape_cast %110 : vector<48x1xi1> to vector<48x1xi1>
    %172 = vector.broadcast %171 : vector<48x1xi1> to vector<48x128xi1>
    %173 = vector.broadcast %cst_51 : f32 to vector<48x128xf32>
    %174 = arith.select %172, %170, %173 : vector<48x128xi1>, vector<48x128xf32>
    %175 = vector.extract_strided_slice %111 {offsets = [8, 0], sizes = [1, 128], strides = [1, 1]} : vector<9x128xf32> to vector<1x128xf32>
    %176 = vector.broadcast %175 : vector<1x128xf32> to vector<48x128xf32>
    %177 = arith.mulf %174, %176 : vector<48x128xf32>
    %178 = arith.addf %169, %177 : vector<48x128xf32>
    %179 = vector.extract_strided_slice %178 {offsets = [8, 0], sizes = [32, 128], strides = [1, 1]} : vector<48x128xf32> to vector<32x128xf32>
    %c0_52 = arith.constant 0 : index
    %c0_53 = arith.constant 0 : index
    %180 = vector.load %arg10[%c0_52, %c0_53] : memref<1x128xf32, #tpu.memory_space<vmem>>, vector<1x128xf32>
    %181 = vector.broadcast %180 : vector<1x128xf32> to vector<32x128xf32>
    %182 = arith.addf %179, %181 : vector<32x128xf32>
    %cst_54 = arith.constant 5.000000e-01 : f32
    %183 = vector.broadcast %cst_54 : f32 to vector<32x128xf32>
    %184 = arith.mulf %183, %182 : vector<32x128xf32>
    %cst_55 = arith.constant 0.707106769 : f32
    %185 = vector.broadcast %cst_55 : f32 to vector<32x128xf32>
    %186 = arith.mulf %182, %185 : vector<32x128xf32>
    %cst_56 = arith.constant 0.000000e+00 : f32
    %187 = vector.broadcast %cst_56 : f32 to vector<32x128xf32>
    %188 = arith.cmpf oge, %186, %187 : vector<32x128xf32>
    %cst_57 = arith.constant 1.000000e+00 : f32
    %cst_58 = arith.constant -1.000000e+00 : f32
    %189 = vector.broadcast %cst_57 : f32 to vector<32x128xf32>
    %190 = vector.broadcast %cst_58 : f32 to vector<32x128xf32>
    %191 = arith.select %188, %189, %190 : vector<32x128xi1>, vector<32x128xf32>
    %192 = math.absf %186 : vector<32x128xf32>
    %cst_59 = arith.constant 0.327591091 : f32
    %193 = vector.broadcast %cst_59 : f32 to vector<32x128xf32>
    %194 = arith.mulf %193, %192 : vector<32x128xf32>
    %cst_60 = arith.constant 1.000000e+00 : f32
    %195 = vector.broadcast %cst_60 : f32 to vector<32x128xf32>
    %196 = arith.addf %195, %194 : vector<32x128xf32>
    %cst_61 = arith.constant 1.000000e+00 : f32
    %197 = vector.broadcast %cst_61 : f32 to vector<32x128xf32>
    %198 = arith.divf %197, %196 : vector<32x128xf32>
    %cst_62 = arith.constant 1.06140542 : f32
    %199 = vector.broadcast %cst_62 : f32 to vector<32x128xf32>
    %200 = arith.mulf %199, %198 : vector<32x128xf32>
    %cst_63 = arith.constant -1.45315206 : f32
    %201 = vector.broadcast %cst_63 : f32 to vector<32x128xf32>
    %202 = arith.addf %200, %201 : vector<32x128xf32>
    %203 = arith.mulf %202, %198 : vector<32x128xf32>
    %cst_64 = arith.constant 1.42141378 : f32
    %204 = vector.broadcast %cst_64 : f32 to vector<32x128xf32>
    %205 = arith.addf %203, %204 : vector<32x128xf32>
    %206 = arith.mulf %205, %198 : vector<32x128xf32>
    %cst_65 = arith.constant -0.284496725 : f32
    %207 = vector.broadcast %cst_65 : f32 to vector<32x128xf32>
    %208 = arith.addf %206, %207 : vector<32x128xf32>
    %209 = arith.mulf %208, %198 : vector<32x128xf32>
    %cst_66 = arith.constant 0.254829586 : f32
    %210 = vector.broadcast %cst_66 : f32 to vector<32x128xf32>
    %211 = arith.addf %209, %210 : vector<32x128xf32>
    %212 = arith.mulf %211, %198 : vector<32x128xf32>
    %cst_67 = arith.constant 0.000000e+00 : f32
    %213 = vector.broadcast %cst_67 : f32 to vector<32x128xf32>
    %214 = arith.subf %213, %192 : vector<32x128xf32>
    %215 = arith.mulf %214, %192 : vector<32x128xf32>
    %216 = math.exp %215 : vector<32x128xf32>
    %217 = arith.mulf %212, %216 : vector<32x128xf32>
    %cst_68 = arith.constant 1.000000e+00 : f32
    %218 = vector.broadcast %cst_68 : f32 to vector<32x128xf32>
    %219 = arith.subf %218, %217 : vector<32x128xf32>
    %220 = arith.mulf %191, %219 : vector<32x128xf32>
    %cst_69 = arith.constant 1.000000e+00 : f32
    %221 = vector.broadcast %cst_69 : f32 to vector<32x128xf32>
    %222 = arith.addf %221, %220 : vector<32x128xf32>
    %223 = arith.mulf %184, %222 : vector<32x128xf32>
    %224 = arith.truncf %223 : vector<32x128xf32> to vector<32x128xbf16>
    %c0_70 = arith.constant 0 : index
    %c0_71 = arith.constant 0 : index
    %225 = vector.load %arg11[%c0_70, %c0_71] : memref<128x32xf32, #tpu.memory_space<vmem>>, vector<128x32xf32>
    %226 = arith.truncf %225 : vector<128x32xf32> to vector<128x32xbf16>
    %cst_72 = arith.constant dense<0.000000e+00> : vector<32x32xf32>
    %227 = tpu.matmul %224, %226, %cst_72 {dimension_numbers = #tpu.dot_dimension_numbers<[1], [0], [0], [1], [0, 0, 1, 1], [], []>} : vector<32x128xbf16>, vector<128x32xbf16>, vector<32x32xf32> -> vector<32x32xf32>
    %c0_73 = arith.constant 0 : index
    %c0_74 = arith.constant 0 : index
    %228 = vector.load %arg12[%c0_73, %c0_74] : memref<1x32xf32, #tpu.memory_space<vmem>>, vector<1x32xf32>
    %229 = vector.broadcast %228 : vector<1x32xf32> to vector<32x32xf32>
    %230 = arith.addf %227, %229 : vector<32x32xf32>
    %231 = arith.addf %230, %6 : vector<32x32xf32>
    %c0_75 = arith.constant 0 : index
    %c0_76 = arith.constant 0 : index
    %c0_77 = arith.constant 0 : index
    %232 = vector.load %arg13[%c0_75, %c0_76, %c0_77] : memref<1x32x32xf32, #tpu.memory_space<vmem>>, vector<1x32x32xf32>
    %233 = vector.shape_cast %232 : vector<1x32x32xf32> to vector<32x32xf32>
    %234 = vector.shape_cast %231 : vector<32x32xf32> to vector<1x32x32xf32>
    tpu.vector_store %arg13[%c0_75, %c0_76, %c0_77], %234 {strides = array<i32>} : memref<1x32x32xf32, #tpu.memory_space<vmem>>, vector<1x32x32xf32>,
    return
  }
  func.func @transform_0(%arg0: i32, %arg1: i32) -> (i32, i32, i32) {
    %c0_i32 = arith.constant 0 : i32
    %c0_i32_0 = arith.constant 0 : i32
    return %arg0, %arg1, %c0_i32 : i32, i32, i32
  }
  func.func @transform_1(%arg0: i32, %arg1: i32) -> (i32, i32, i32) {
    %c4_i32 = arith.constant 4 : i32
    %0 = arith.muli %arg1, %c4_i32 : i32
    %c1_i32 = arith.constant 1 : i32
    %1 = arith.subi %0, %c1_i32 : i32
    %c0_i32 = arith.constant 0 : i32
    %2 = arith.maxsi %1, %c0_i32 : i32
    %c0_i32_0 = arith.constant 0 : i32
    %c0_i32_1 = arith.constant 0 : i32
    return %arg0, %2, %c0_i32_0 : i32, i32, i32
  }
  func.func @transform_2(%arg0: i32, %arg1: i32) -> (i32, i32, i32) {
    %c1_i32 = arith.constant 1 : i32
    %0 = arith.addi %arg1, %c1_i32 : i32
    %c4_i32 = arith.constant 4 : i32
    %1 = arith.muli %0, %c4_i32 : i32
    %c7_i32 = arith.constant 7 : i32
    %2 = arith.minsi %1, %c7_i32 : i32
    %c0_i32 = arith.constant 0 : i32
    %c0_i32_0 = arith.constant 0 : i32
    return %arg0, %2, %c0_i32 : i32, i32, i32
  }
  func.func @transform_3(%arg0: i32, %arg1: i32) -> (i32, i32) {
    %c0_i32 = arith.constant 0 : i32
    %c0_i32_0 = arith.constant 0 : i32
    %c0_i32_1 = arith.constant 0 : i32
    return %c0_i32, %c0_i32_0 : i32, i32
  }
  func.func @transform_4(%arg0: i32, %arg1: i32) -> (i32, i32) {
    %c0_i32 = arith.constant 0 : i32
    %c0_i32_0 = arith.constant 0 : i32
    %c0_i32_1 = arith.constant 0 : i32
    return %c0_i32, %c0_i32_0 : i32, i32
  }
  func.func @transform_5(%arg0: i32, %arg1: i32) -> (i32, i32) {
    %c0_i32 = arith.constant 0 : i32
    %c0_i32_0 = arith.constant 0 : i32
    %c0_i32_1 = arith.constant 0 : i32
    return %c0_i32, %c0_i32_0 : i32, i32
  }
  func.func @transform_6(%arg0: i32, %arg1: i32) -> (i32, i32) {
    %c0_i32 = arith.constant 0 : i32
    %c0_i32_0 = arith.constant 0 : i32
    %c0_i32_1 = arith.constant 0 : i32
    return %c0_i32, %c0_i32_0 : i32, i32
  }
  func.func @transform_7(%arg0: i32, %arg1: i32) -> (i32, i32) {
    %c0_i32 = arith.constant 0 : i32
    %c0_i32_0 = arith.constant 0 : i32
    %c0_i32_1 = arith.constant 0 : i32
    return %c0_i32, %c0_i32_0 : i32, i32
  }
  func.func @transform_8(%arg0: i32, %arg1: i32) -> (i32, i32) {
    %c0_i32 = arith.constant 0 : i32
    %c0_i32_0 = arith.constant 0 : i32
    %c0_i32_1 = arith.constant 0 : i32
    return %c0_i32, %c0_i32_0 : i32, i32
  }
  func.func @transform_9(%arg0: i32, %arg1: i32) -> (i32, i32) {
    %c0_i32 = arith.constant 0 : i32
    %c0_i32_0 = arith.constant 0 : i32
    %c0_i32_1 = arith.constant 0 : i32
    return %c0_i32, %c0_i32_0 : i32, i32
  }
  func.func @transform_10(%arg0: i32, %arg1: i32) -> (i32, i32) {
    %c0_i32 = arith.constant 0 : i32
    %c0_i32_0 = arith.constant 0 : i32
    %c0_i32_1 = arith.constant 0 : i32
    return %c0_i32, %c0_i32_0 : i32, i32
  }
  func.func @transform_11(%arg0: i32, %arg1: i32) -> (i32, i32, i32) {
    %c0_i32 = arith.constant 0 : i32
    %c0_i32_0 = arith.constant 0 : i32
    return %arg0, %arg1, %c0_i32 : i32, i32, i32
  }
}

</mosaic_0001>

<bundles_post_ra>
// kernel: seg_layer_forward.4
= control target key start
LH: loop header
LB: loop body
LE: loop exit
PB: predicated region body
PF: predicated region fallthrough
CT: control target
= control target key end

     0   :  { %s772_s21 = smov 0   ;;  %s907_s0 = inlined_call_operand.vmem [shape: f32[128,32], index: 0, kind: input, shape index: {}]   ;;  %s908_s1 = inlined_call_operand.vmem [shape: f32[1,32], index: 1, kind: input, shape index: {}]   ;;  %s909_s2 = inlined_call_operand.vmem [shape: f32[1,32], index: 2, kind: input, shape index: {}]   ;;  %s910_s3 = inlined_call_operand.vmem [shape: f32[32,32], index: 3, kind: input, shape index: {}]   ;;  %s911_s4 = inlined_call_operand.vmem [shape: f32[1,32], index: 4, kind: input, shape index: {}]   ;;  %s912_s5 = inlined_call_operand.vmem [shape: bf16[128,32], index: 5, kind: output, shape index: {0}]   ;;  %s913_s6 = inlined_call_operand.vmem [shape: f32[128,32], index: 6, kind: output, shape index: {1}]  }
   0x1 LB: > { %s647_s22 = sadd.s32 4294967295, %s735_s21   ;;  %p651_p0 = scmp.ge.s32.totalorder %s735_s21, 1  ;;  %s735_s21 = sphi %s772_s21, %s17_s21  }
   0x2   : > { %p216_p1 = scmp.lt.s32.totalorder %s735_s21, 3 }
   0x4   : > { %p217_p2 = pnand %p651_p0, %p216_p1 }
   0x5   : > { %s652_s23 = sshll.u32 (!%p217_p2), %s647_s22, 3  ;;  %vm280_vm0 = vcmask (!%p217_p2), 261120   ;;  %v418_v56 = vld [vmem:[%s910_s3] sm:$0xff] (!%p217_p2)  ;;  %v419_v57 = vld [vmem:[%s910_s3 + $0x8] sm:$0xff] (!%p217_p2)  ;;  %v420_v59 = vld [vmem:[%s910_s3 + $0x10] sm:$0xff] (!%p217_p2)  ;;  %vm540_vm1 = vcmask (!%p217_p2), 257024  }
   0x6   : > { %220 = sbr.rel (%p217_p2) target bundleno = 568 (0x238), region = 40  ;;  %p252_p3 = scmp.lt.s32.totalorder (!%p217_p2), %s652_s23, 15  ;;  %v422_v58 = vpack.c.bf16 (!%p217_p2), %v419_v57, %v418_v56  ;;  %v421_v60 = vld [vmem:[%s910_s3 + $0x18] sm:$0xff] (!%p217_p2) }
   0x7   : > { %v423_v61 = vpack.c.bf16 (!%p217_p2), %v421_v60, %v420_v59 }
   0x8   : > { %689 = vmatprep.subr.bf16.mxu0 (!%p217_p2), %v422_v58  ;;  %701 = vmatprep.subr.bf16.mxu1 (!%p217_p2), %v422_v58 }
   0x9   : > { %690 = vmatpush3.bf16.msra.mxu0 (!%p217_p2), %v422_v58  ;;  %703 = vmatpush3.bf16.msra.mxu1 (!%p217_p2), %v422_v58 }
   0xa   : > { %691 = vmatprep.subr.bf16.mxu0 (!%p217_p2), %v423_v61  ;;  %702 = vmatprep.subr.bf16.mxu1 (!%p217_p2), %v423_v61 }
   0xd   : > { %s915_s23 = smov (!%p252_p3, %s652_s23), 15  ;;  %692 = vmatpush3.bf16.msra.mxu0 %v423_v61  ;;  %704 = vmatpush3.bf16.msra.mxu1 %v423_v61 }
   0xe   : > { %s653_s24 = sshll.u32 %s915_s23, 3  ;;  %s655_s22 = sshll.u32 %s915_s23, 2 }
   0xf   : > { %s255_s27 = scalar_lea.vmem %s907_s0, %s653_s24  ;;  %s860_s18 = scalar_lea.vmem %s913_s6, %s653_s24 }
  0x10   : > { %v270_v0 = vld [vmem:[%s255_s27] sm:$0xff]  ;;  %v271_v2 = vld [vmem:[%s255_s27 + $0x8] sm:$0xff]  ;;  %v272_v8 = vld [vmem:[%s255_s27 + $0x10] sm:$0xff]  ;;  %s261_s26 = scalar_lea.vmem %s912_s5, %s655_s22 }
  0x11   : > { %v274_v1 = vld [vmem:[%s255_s27 + $0x20] sm:$0xff]  ;;  %v281_v3 = vsel %vm280_vm0, %v270_v0, 0.0  ;;  %v275_v5 = vld [vmem:[%s255_s27 + $0x28] sm:$0xff]  ;;  %v284_v6 = vsel %vm280_vm0, %v271_v2, 0.0  ;;  %v273_v9 = vld [vmem:[%s255_s27 + $0x18] sm:$0xff]  ;;  %v287_v10 = vsel %vm280_vm0, %v272_v8, 0.0 }
  0x12   : > { %v293_v4 = vsel %vm280_vm0, %v274_v1, 0.0  ;;  %282 = vadd.xlane.f32.xlu0 %v281_v3  ;;  %v296_v7 = vsel %vm280_vm0, %v275_v5, 0.0  ;;  %v290_v11 = vsel %vm280_vm0, %v273_v9, 0.0  ;;  %v276_v12 = vld [vmem:[%s255_s27 + $0x30] sm:$0xff]  ;;  %v277_v13 = vld [vmem:[%s255_s27 + $0x38] sm:$0xff] }
  0x13   : > { %294 = vadd.xlane.f32.xlu1 %v293_v4  ;;  %v299_v14 = vsel %vm280_vm0, %v276_v12, 0.0  ;;  %v302_v15 = vsel %vm280_vm0, %v277_v13, 0.0 }
  0x16   : > { %285 = vadd.xlane.f32.xlu0 %v284_v6 }
  0x17   : > { %297 = vadd.xlane.f32.xlu1 %v296_v7 }
  0x1a   : > { %288 = vadd.xlane.f32.xlu0 %v287_v10 }
  0x1b   : > { %291 = vadd.xlane.f32.xlu1 %v290_v11 }
  0x1e   : > { %300 = vadd.xlane.f32.xlu0 %v299_v14 }
  0x1f   : > { %303 = vadd.xlane.f32.xlu1 %v302_v15 }
  0x9f   : > { %v283_v16 = vpop.xlane.xlu0 %282 }
  0xa0   : > { %v295_v17 = vpop.xlane.xlu1 %294  ;;  %v306_v18 = vmul.f32 0.03125, %v283_v16 }
  0xa1   : > { %v310_v19 = vmul.f32 0.03125, %v295_v17 }
  0xa2   : > { %v796_v20 = vsub.f32 %v270_v0, %v306_v18 }
  0xa3   : > { %v798_v21 = vsub.f32 %v274_v1, %v310_v19  ;;  %v286_v22 = vpop.xlane.xlu0 %285 }
  0xa4   : > { %v298_v23 = vpop.xlane.xlu1 %297  ;;  %v307_v24 = vmul.f32 0.03125, %v286_v22  ;;  %v322_v26 = vmul.f32 %v796_v20, %v796_v20  ;;  %v658_v22 = vld [vmem:[%s908_s1] ss:$0 sm:$0xff] }
  0xa5   : > { %v311_v25 = vmul.f32 0.03125, %v298_v23  ;;  %v326_v27 = vmul.f32 %v798_v21, %v798_v21 }
  0xa6   : > { %v804_v28 = vsub.f32 %v271_v2, %v307_v24  ;;  %v330_v30 = vsel %vm280_vm0, %v322_v26, 0.0  ;;  %v659_v26 = vld [vmem:[%s909_s2] ss:$0 sm:$0xff] }
  0xa7   : > { %v806_v29 = vsub.f32 %v275_v5, %v311_v25  ;;  %331 = vadd.xlane.f32.xlu0 %v330_v30  ;;  %v289_v31 = vpop.xlane.xlu0 %288  ;;  %v342_v33 = vsel %vm280_vm0, %v326_v27, 0.0 }
  0xa8   : > { %v292_v32 = vpop.xlane.xlu1 %291  ;;  %v308_v34 = vmul.f32 0.03125, %v289_v31  ;;  %v323_v36 = vmul.f32 %v804_v28, %v804_v28 }
  0xa9   : > { %v309_v35 = vmul.f32 0.03125, %v292_v32  ;;  %v327_v37 = vmul.f32 %v806_v29, %v806_v29 }
  0xaa   : > { %v814_v38 = vsub.f32 %v272_v8, %v308_v34  ;;  %v333_v40 = vsel %vm280_vm0, %v323_v36, 0.0 }
  0xab   : > { %v816_v39 = vsub.f32 %v273_v9, %v309_v35  ;;  %343 = vadd.xlane.f32.xlu0 %v342_v33  ;;  %334 = vadd.xlane.f32.xlu1 %v333_v40  ;;  %v301_v41 = vpop.xlane.xlu0 %300  ;;  %v345_v43 = vsel %vm280_vm0, %v327_v37, 0.0 }
  0xac   : > { %v304_v42 = vpop.xlane.xlu1 %303  ;;  %v312_v44 = vmul.f32 0.03125, %v301_v41  ;;  %v324_v46 = vmul.f32 %v814_v38, %v814_v38 }
  0xad   : > { %v313_v45 = vmul.f32 0.03125, %v304_v42  ;;  %v325_v47 = vmul.f32 %v816_v39, %v816_v39 }
  0xae   : > { %v824_v48 = vsub.f32 %v276_v12, %v312_v44  ;;  %v336_v50 = vsel %vm280_vm0, %v324_v46, 0.0 }
  0xaf   : > { %v826_v49 = vsub.f32 %v277_v13, %v313_v45  ;;  %346 = vadd.xlane.f32.xlu1 %v345_v43  ;;  %337 = vadd.xlane.f32.xlu0 %v336_v50  ;;  %v339_v51 = vsel %vm280_vm0, %v325_v47, 0.0 }
  0xb0   : > { %v328_v52 = vmul.f32 %v824_v48, %v824_v48 }
  0xb1   : > { %v329_v53 = vmul.f32 %v826_v49, %v826_v49 }
  0xb2   : > { %v348_v54 = vsel %vm280_vm0, %v328_v52, 0.0 }
  0xb3   : > { %340 = vadd.xlane.f32.xlu1 %v339_v51  ;;  %349 = vadd.xlane.f32.xlu0 %v348_v54  ;;  %v351_v55 = vsel %vm280_vm0, %v329_v53, 0.0 }
  0xb7   : > { %352 = vadd.xlane.f32.xlu1 %v351_v55 }
 0x134   : > { %v332_v62 = vpop.xlane.xlu0 %331 }
 0x135   : > { %v354_v63 = vmul.f32 0.03125, %v332_v62 }
 0x137   : > { %v362_v0 = vadd.f32 1e-06, %v354_v63 }
 0x138   : > { %v335_v1 = vpop.xlane.xlu1 %334  ;;  %v344_v2 = vpop.xlane.xlu0 %343 }
 0x139   : > { %713 = vrsqrt.f32 %v362_v0  ;;  %v355_v3 = vmul.f32 0.03125, %v335_v1  ;;  %v358_v4 = vmul.f32 0.03125, %v344_v2 }
 0x13b   : > { %v363_v5 = vadd.f32 1e-06, %v355_v3  ;;  %v366_v6 = vadd.f32 1e-06, %v358_v4 }
 0x13c   : > { %v347_v7 = vpop.xlane.xlu1 %346  ;;  %v338_v8 = vpop.xlane.xlu0 %337 }
 0x13d   : > { %715 = vrsqrt.f32 %v363_v5  ;;  %v359_v9 = vmul.f32 0.03125, %v347_v7  ;;  %v356_v10 = vmul.f32 0.03125, %v338_v8 }
 0x13e   : > { %717 = vrsqrt.f32 %v366_v6 }
 0x13f   : > { %v367_v11 = vadd.f32 1e-06, %v359_v9  ;;  %v364_v12 = vadd.f32 1e-06, %v356_v10 }
 0x140   : > { %v341_v13 = vpop.xlane.xlu1 %340  ;;  %v350_v14 = vpop.xlane.xlu0 %349 }
 0x141   : > { %719 = vrsqrt.f32 %v367_v11  ;;  %v357_v15 = vmul.f32 0.03125, %v341_v13  ;;  %v360_v16 = vmul.f32 0.03125, %v350_v14 }
 0x142   : > { %721 = vrsqrt.f32 %v364_v12 }
 0x143   : > { %v714_v17 = vpop.eup %713  ;;  %v365_v18 = vadd.f32 1e-06, %v357_v15  ;;  %v368_v19 = vadd.f32 1e-06, %v360_v16 }
 0x144   : > { %v353_v23 = vpop.xlane.xlu1 %352  ;;  %v378_v24 = vmul.f32 %v714_v17, %v796_v20 }
 0x145   : > { %723 = vrsqrt.f32 %v365_v18  ;;  %v361_v25 = vmul.f32 0.03125, %v353_v23 }
 0x146   : > { %725 = vrsqrt.f32 %v368_v19  ;;  %v392_v27 = vmul.f32 %v658_v22, %v378_v24 }
 0x147   : > { %v716_v30 = vpop.eup %715  ;;  %v369_v31 = vadd.f32 1e-06, %v361_v25 }
 0x148   : > { %v718_v32 = vpop.eup %717  ;;  %v379_v20 = vmul.f32 %v716_v30, %v804_v28  ;;  %v406_v33 = vadd.f32 %v659_v26, %v392_v27 }
 0x149   : > { %727 = vrsqrt.f32 %v369_v31  ;;  %v382_v34 = vmul.f32 %v718_v32, %v798_v21 }
 0x14a   : > { %v393_v35 = vmul.f32 %v658_v22, %v379_v20  ;;  %549 = vst.msk [vmem:[%s860_s18] sm:$0xff] %vm280_vm0, %v406_v33 }
 0x14b   : > { %v720_v36 = vpop.eup %719  ;;  %v396_v37 = vmul.f32 %v658_v22, %v382_v34 }
 0x14c   : > { %v722_v40 = vpop.eup %721  ;;  %v407_v41 = vadd.f32 %v659_v26, %v393_v35  ;;  %v383_v42 = vmul.f32 %v720_v36, %v806_v29 }
 0x14d   : > { %v380_v43 = vmul.f32 %v722_v40, %v814_v38  ;;  %v410_v44 = vadd.f32 %v659_v26, %v396_v37 }
 0x14e   : > { %v414_v45 = vpack.c.bf16 %v407_v41, %v406_v33  ;;  %550 = vst.msk [vmem:[%s860_s18 + $0x8] sm:$0xff] %vm280_vm0, %v407_v41  ;;  %v397_v28 = vmul.f32 %v658_v22, %v383_v42 }
 0x14f   : > { %v724_v46 = vpop.eup %723  ;;  %553 = vst.msk [vmem:[%s860_s18 + $0x20] sm:$0xff] %vm280_vm0, %v410_v44  ;;  %v394_v21 = vmul.f32 %v658_v22, %v380_v43 }
 0x150   : > { %v726_v47 = vpop.eup %725  ;;  %v381_v50 = vmul.f32 %v724_v46, %v816_v39  ;;  %693 = vmatprep.mubr.msk.bf16.mxu0 %vm280_vm0, %v414_v45  ;;  %v411_v29 = vadd.f32 %v659_v26, %v397_v28 }
 0x151   : > { %v384_v38 = vmul.f32 %v726_v47, %v824_v48  ;;  %v408_v51 = vadd.f32 %v659_v26, %v394_v21 }
 0x152   : > { %v416_v52 = vpack.c.bf16 %v411_v29, %v410_v44  ;;  %554 = vst.msk [vmem:[%s860_s18 + $0x28] sm:$0xff] %vm280_vm0, %v411_v29  ;;  %v395_v53 = vmul.f32 %v658_v22, %v381_v50 }
 0x153   : > { %v728_v54 = vpop.eup %727  ;;  %551 = vst.msk [vmem:[%s860_s18 + $0x10] sm:$0xff] %vm280_vm0, %v408_v51  ;;  %v398_v55 = vmul.f32 %v658_v22, %v384_v38 }
 0x154   : > { %v385_v39 = vmul.f32 %v728_v54, %v826_v49  ;;  %697 = vmatprep.mubr.msk.bf16.mxu1 %vm280_vm0, %v416_v52  ;;  %v409_v56 = vadd.f32 %v659_v26, %v395_v53  ;;  %v660_v49 = vld [vmem:[%s911_s4] ss:$0 sm:$0xff] }
 0x155   : > { %v412_v57 = vadd.f32 %v659_v26, %v398_v55 }
 0x156   : > { %v415_v58 = vpack.c.bf16 %v409_v56, %v408_v51  ;;  %552 = vst.msk [vmem:[%s860_s18 + $0x18] sm:$0xff] %vm280_vm0, %v409_v56  ;;  %v399_v48 = vmul.f32 %v658_v22, %v385_v39 }
 0x157   : > { %555 = vst.msk [vmem:[%s860_s18 + $0x30] sm:$0xff] %vm280_vm0, %v412_v57 }
 0x158   : > { %694 = vmatmul.mubr.msk.bf16.vlgmr.msra.gmra.mrb[0].mxu0 %vm280_vm0, %v415_v58  ;;  %v413_v59 = vadd.f32 %v659_v26, %v399_v48 }
 0x15a   : > { %v417_v60 = vpack.c.bf16 %v413_v59, %v412_v57  ;;  %556 = vst.msk [vmem:[%s860_s18 + $0x38] sm:$0xff] %vm280_vm0, %v413_v59 }
 0x15c   : > { %698 = vmatmul.mubr.msk.bf16.vlgmr.msra.gmra.mrb[0].mxu1 %vm280_vm0, %v417_v60 }
 0x22b   : > { %v695_v61 = vpop.f32.mrb[0].mxu0 }
 0x22c   : > { %v486_v62 = vadd.f32 %v695_v61, %v660_v49  ;;  %v477_v63 = vpop.f32.mrb[1].mxu0 }
 0x22d   : > { %v478_v0 = vadd.f32 %v660_v49, %v477_v63  ;;  %v696_v1 = vpop.f32.mrb[2].mxu0 }
 0x22e   : > { %v677_v2 = vpack.c.bf16 %v486_v62, %v486_v62  ;;  %v489_v3 = vadd.f32 %v696_v1, %v660_v49  ;;  %v480_v4 = vpop.f32.mrb[3].mxu0 }
 0x22f   : > { %v675_v5 = vpack.c.bf16 %v478_v0, %v478_v0  ;;  %v481_v6 = vadd.f32 %v660_v49, %v480_v4  ;;  %v699_v7 = vpop.f32.mrb[0].mxu1 }
 0x230   : > { %543 = vst.msk [vmem:[%s261_s26 + $0x8] sm:$0xf] %vm540_vm1, %v677_v2  ;;  %v678_v8 = vpack.c.bf16 %v489_v3, %v489_v3  ;;  %v502_v9 = vadd.f32 %v699_v7, %v660_v49  ;;  %v493_v10 = vpop.f32.mrb[1].mxu1 }
 0x231   : > { %541 = vst.msk [vmem:[%s261_s26] sm:$0xf] %vm540_vm1, %v675_v5  ;;  %v676_v11 = vpack.c.bf16 %v481_v6, %v481_v6  ;;  %v494_v12 = vadd.f32 %v660_v49, %v493_v10  ;;  %v700_v13 = vpop.f32.mrb[2].mxu1 }
 0x232   : > { %544 = vst.msk [vmem:[%s261_s26 + $0xc] sm:$0xf] %vm540_vm1, %v678_v8  ;;  %v681_v14 = vpack.c.bf16 %v502_v9, %v502_v9  ;;  %v505_v15 = vadd.f32 %v700_v13, %v660_v49  ;;  %v496_v16 = vpop.f32.mrb[3].mxu1 }
 0x233   : > { %542 = vst.msk [vmem:[%s261_s26 + $0x4] sm:$0xf] %vm540_vm1, %v676_v11  ;;  %v679_v17 = vpack.c.bf16 %v494_v12, %v494_v12  ;;  %v497_v18 = vadd.f32 %v660_v49, %v496_v16 }
 0x234   : > { %547 = vst.msk [vmem:[%s261_s26 + $0x18] sm:$0xf] %vm540_vm1, %v681_v14  ;;  %v682_v19 = vpack.c.bf16 %v505_v15, %v505_v15 }
 0x235   : > { %545 = vst.msk [vmem:[%s261_s26 + $0x10] sm:$0xf] %vm540_vm1, %v679_v17  ;;  %v680_v22 = vpack.c.bf16 %v497_v18, %v497_v18 }
 0x236   : > { %548 = vst.msk [vmem:[%s261_s26 + $0x1c] sm:$0xf] %vm540_vm1, %v682_v19 }
 0x237   : > { %546 = vst.msk [vmem:[%s261_s26 + $0x14] sm:$0xf] %vm540_vm1, %v680_v22 }
 0x238 PF: > { %s17_s21 = sadd.s32 1, %s735_s21  }
 0x239   : > { %p14_p4 = scmp.ge.s32.totalorder %s17_s21, 4  }
 0x23b   :  { %16 = sbr.rel (!%p14_p4) target bundleno = 1 (0x1), region = 82 }

// kernel: seg_layer_forward.6
= control target key start
LH: loop header
LB: loop body
LE: loop exit
PB: predicated region body
PF: predicated region fallthrough
CT: control target
= control target key end

     0   :  { %s1192_s18 = smov 0   ;;  %s1194_s19 = smov 0   ;;  %s1310_s0 = inlined_call_operand.vmem [shape: bf16[2,64,32], index: 0, kind: input, shape index: {}]   ;;  %s1311_s1 = inlined_call_operand.vmem [shape: bf16[2,16,64], index: 1, kind: input, shape index: {}]   ;;  %s1312_s2 = inlined_call_operand.vmem [shape: f32[2,64,32], index: 2, kind: input, shape index: {}]   ;;  %s1313_s3 = inlined_call_operand.vmem [shape: f32[32,32], index: 3, kind: input, shape index: {}]   ;;  %s1314_s4 = inlined_call_operand.vmem [shape: f32[1,32], index: 4, kind: input, shape index: {}]   ;;  %s1315_s5 = inlined_call_operand.vmem [shape: f32[2,64,32], index: 5, kind: output, shape index: {}]  }
   0x1   :  { %s1196_s20 = smov 0   ;;  %s1198_s21 = smov 0  }
   0x2   :  { %s1200_s22 = smov 0  }
   0x3 LB: > { %s24_s23 = sadd.s32 1, %s1149_s20  ;;  %s27_s24 = sadd.s32 1, %s1153_s21  ;;  %s1157_s22 = sphi %s1200_s22, %s15_s22   ;;  %s1153_s21 = sphi %s1198_s21, %s1319_s21   ;;  %s1149_s20 = sphi %s1196_s20, %s1318_s20   ;;  %s1145_s19 = sphi %s1194_s19, %s1317_s19   ;;  %s1141_s18 = sphi %s1192_s18, %s1316_s18  }
   0x4   : > { %p25_p0 = scmp.ge.s32.totalorder %s24_s23, 2  ;;  %p946_p1 = scmp.ge.s32.totalorder %s1157_s22, 1 }
   0x5   : > { %p235_p2 = scmp.lt.s32.totalorder %s1157_s22, 5 }
   0x6   : > { %s1321_s23 = smov (%p25_p0, %s24_s23), 0  ;;  %s1323_s24 = smov (!%p25_p0, %s27_s24), %s1153_s21 }
   0x7   : > { %p236_p3 = pnand %p946_p1, %p235_p2  ;;  %p29_p4 = scmp.ge.s32.totalorder %s1323_s24, 2 }
   0x8   : > { %p286_p5 = scmp.lt.s32.totalorder (!%p236_p3), %s1145_s19, 1  ;;  %s947_s25 = sshll.u32 (!%p236_p3), %s1141_s18, 2  ;;  %vm350_vm0 = vcmask (!%p236_p3), 130048   ;;  %v515_v51 = vld [vmem:[%s1313_s3] sm:$0xff] (!%p236_p3)  ;;  %v516_v52 = vld [vmem:[%s1313_s3 + $0x8] sm:$0xff] (!%p236_p3)  ;;  %vm817_vm1 = vcmask (!%p236_p3), 261120  }
   0x9   : > { %s1325_s24 = smov (%p29_p4, %s1323_s24), 0  ;;  %239 = sbr.rel (%p236_p3) target bundleno = 1549 (0x60d), region = 40 }
   0xa   : > { %p288_p6 = scmp.lt.s32.totalorder (!%p236_p3), %s947_s25, 7  ;;  %s1159_s10 = smov (!%p236_p3), 112   ;;  %v517_v53 = vpack.c.bf16 (!%p236_p3), %v516_v52, %v515_v51 }
   0xb   : > { %s1160_s11 = smov (!%p236_p3), 96   ;;  %s1161_s16 = smov (!%p236_p3), 80  }
   0xc   : > { %1007 = vmatprep.subr.bf16.mxu1 (!%p236_p3), %v517_v53 }
   0xd   : > { %1008 = vmatpush3.bf16.msra.mxu1 (!%p236_p3), %v517_v53 }
  0x10   : > { %s1327_s19 = smov (!%p286_p5, %s1145_s19), 1  ;;  %s1329_s25 = smov (!%p288_p6, %s947_s25), 7 }
  0x11   : > { %s948_s26 = sshll.u32 %s1327_s19, 3 }
  0x12   : > { %s299_s29 = scalar_lea.vmem %s1311_s1, %s948_s26  ;;  %s1225_s30 = sadd.s32 %s948_s26, %s1329_s25 }
  0x13   : > { %v1227_v0 = vld [vmem:[%s299_s29] sm:$0xff]   ;;  %s949_s6 = sshll.u32 %s1225_s30, 2  ;;  %s954_s26 = sshll.u32 %s1225_s30, 3 }
  0x14   : > { %s293_s9 = scalar_lea.vmem %s1310_s0, %s949_s6  ;;  %1039 = vmatprep.subr.msk.bf16.mxu0 %vm350_vm0, %v1227_v0  ;;  %v358_v1 = vsel %vm350_vm0, %v1227_v0, 0  ;;  %s308_s29 = scalar_lea.vmem %s1312_s2, %s954_s26 }
  0x15   : > { %v1085_v2 = vld [vmem:[%s293_s9] sm:$0xff]   ;;  %996 = vmatpush3.bf16.xpose.msra.mxu0 %v358_v1  ;;  %v1086_v3 = vld [vmem:[%s293_s9 + $0x8] sm:$0xff]  }
  0x16   : > { %997 = vmatprep.mubr.msk.bf16.mxu0 %vm350_vm0, %v1085_v2  ;;  %v809_v53 = vld [vmem:[%s308_s29] sm:$0xff] }
  0x1c   : > { %998 = vmatmul.mubr.msk.bf16.vlgmr.msra.gmra.mrb[0].mxu0 %vm350_vm0, %v1086_v3 }
  0xef   : > { %v999_v4 = vpop.f32.mrb[0].mxu0 }
  0xf0   : > { %v394_v5 = vpop.f32.mrb[1].mxu0  ;;  %v415_v6 = vsel %vm350_vm0, %v999_v4, -inf }
  0xf1   : > { %416 = vmax.xlane.f32.xlu1 %v415_v6  ;;  %v1000_v7 = vpop.f32.mrb[2].mxu0  ;;  %v409_v8 = vsel %vm350_vm0, %v394_v5, -inf }
  0xf2   : > { %410 = vmax.xlane.f32.xlu0 %v409_v8  ;;  %v397_v9 = vpop.f32.mrb[3].mxu0  ;;  %v418_v10 = vsel %vm350_vm0, %v1000_v7, -inf }
  0xf3   : > { %v412_v11 = vsel %vm350_vm0, %v397_v9, -inf }
  0xf5   : > { %419 = vmax.xlane.f32.xlu1 %v418_v10 }
  0xf6   : > { %413 = vmax.xlane.f32.xlu0 %v412_v11 }
 0x106   : > { %581 = vrot.lane.b32.xlu1 %v1227_v0, %s1159_s10 }
 0x17e   : > { %v417_v12 = vpop.xlane.xlu1 %416 }
 0x17f   : > { %v423_v13 = vsub.f32 %v999_v4, %v417_v12  ;;  %v411_v14 = vpop.xlane.xlu0 %410 }
 0x180   : > { %v421_v15 = vsub.f32 %v394_v5, %v411_v14 }
 0x181   : > { %v429_v16 = vmul.f32 1.442695, %v423_v13 }
 0x182   : > { %v425_v17 = vmul.f32 1.442695, %v421_v15  ;;  %v420_v18 = vpop.xlane.xlu1 %419 }
 0x183   : > { %1087 = vpow2.f32 %v429_v16  ;;  %v424_v19 = vsub.f32 %v1000_v7, %v420_v18  ;;  %v414_v20 = vpop.xlane.xlu0 %413 }
 0x184   : > { %v422_v21 = vsub.f32 %v397_v9, %v414_v20  ;;  %1089 = vpow2.f32 %v425_v17 }
 0x185   : > { %v431_v22 = vmul.f32 1.442695, %v424_v19 }
 0x186   : > { %v427_v23 = vmul.f32 1.442695, %v422_v21  ;;  %v582_v32 = vpop.permute.xlu1 %581 }
 0x187   : > { %1091 = vpow2.f32 %v431_v22  ;;  %v590_v49 = vsel %vm350_vm0, %v582_v32, 0 }
 0x188   : > { %1093 = vpow2.f32 %v427_v23 }
 0x18d   : > { %v1088_v24 = vpop.eup %1087 }
 0x18e   : > { %v439_v25 = vsel %vm350_vm0, %v1088_v24, 0.0  ;;  %v1090_v26 = vpop.eup %1089 }
 0x18f   : > { %440 = vadd.xlane.f32.xlu0 %v439_v25  ;;  %v433_v29 = vsel %vm350_vm0, %v1090_v26, 0.0 }
 0x191   : > { %v1092_v27 = vpop.eup %1091 }
 0x192   : > { %v442_v28 = vsel %vm350_vm0, %v1092_v27, 0.0  ;;  %v1094_v30 = vpop.eup %1093 }
 0x193   : > { %443 = vadd.xlane.f32.xlu1 %v442_v28  ;;  %434 = vadd.xlane.f32.xlu0 %v433_v29  ;;  %v436_v31 = vsel %vm350_vm0, %v1094_v30, 0.0  ;;  %v747_v29 = vld [vmem:[%s1313_s3 + $0x10] sm:$0xff] }
 0x197   : > { %437 = vadd.xlane.f32.xlu1 %v436_v31 }
 0x1a8   : > { %577 = vrot.lane.b32.xlu1 %v1085_v2, %s1159_s10 }
 0x1a9   : > { %455 = vrot.lane.b32.xlu0 %v1227_v0, %s1160_s11 }
 0x1ac   : > { %579 = vrot.lane.b32.xlu1 %v1086_v3, %s1159_s10  ;;  %s318_s10 = scalar_lea.vmem %s1315_s5, %s954_s26 }
 0x21c   : > { %v441_v33 = vpop.xlane.xlu0 %440 }
 0x220   : > { %v444_v34 = vpop.xlane.xlu1 %443  ;;  %v435_v35 = vpop.xlane.xlu0 %434 }
 0x221   : > { %1095 = vrcp.f32 %v444_v34 }
 0x222   : > { %1097 = vrcp.f32 %v435_v35 }
 0x223   : > { %1099 = vrcp.f32 %v441_v33 }
 0x224   : > { %v438_v36 = vpop.xlane.xlu1 %437  ;;  %v456_v37 = vpop.permute.xlu0 %455 }
 0x225   : > { %1101 = vrcp.f32 %v438_v36  ;;  %1001 = vmatprep.subr.bf16.mxu0 %v456_v37 }
 0x226   : > { %1002 = vmatpush3.bf16.msra.mxu0 %v456_v37 }
 0x227   : > { %1040 = vmatprep.subr.msk.bf16.mxu0 %vm350_vm0, %v582_v32 }
 0x228   : > { %v578_v48 = vpop.permute.xlu1 %577 }
 0x22b   : > { %v1096_v38 = vpop.eup %1095 }
 0x22c   : > { %v1098_v39 = vpop.eup %1097  ;;  %v452_v42 = vmul.f32 %v1096_v38, %v1092_v27  ;;  %v580_v50 = vpop.permute.xlu1 %579 }
 0x22d   : > { %v1100_v40 = vpop.eup %1099  ;;  %v449_v43 = vmul.f32 %v1098_v39, %v1090_v26 }
 0x22e   : > { %v451_v45 = vmul.f32 %v1100_v40, %v1088_v24 }
 0x22f   : > { %v1102_v41 = vpop.eup %1101 }
 0x230   : > { %v450_v44 = vmul.f32 %v1102_v41, %v1094_v30  ;;  %v454_v47 = vpack.c.bf16 %v452_v42, %v451_v45  ;;  %v748_v30 = vld [vmem:[%s1313_s3 + $0x18] sm:$0xff] }
 0x231   : > { %v749_v31 = vpack.c.bf16 %v748_v30, %v747_v29 }
 0x232   : > { %v453_v46 = vpack.c.bf16 %v450_v44, %v449_v43 }
 0x234   : > { %1003 = vmatprep.mubr.msk.bf16.mxu0 %vm350_vm0, %v453_v46 }
 0x235   : > { %1004 = vmatmul.mubr.msk.bf16.vlgmr.msra.gmra.mrb[4].mxu0 %vm350_vm0, %v454_v47 }
 0x236   : > { %1014 = vmatpush3.bf16.xpose.msra.mxu0 %v590_v49  ;;  %1015 = vmatprep.mubr.msk.bf16.mxu0 %vm350_vm0, %v578_v48  ;;  %v958_v48 = vld [vmem:[%s1314_s4] ss:$0 sm:$0xff] }
 0x23d   : > { %1016 = vmatmul.mubr.msk.bf16.vlgmr.msra.gmra.mrb[8].mxu0 %vm350_vm0, %v580_v50  ;;  %v811_v50 = vld [vmem:[%s308_s29 + $0x10] sm:$0xff] }
 0x308   : > { %v1005_v54 = vpop.f32.mrb[4].mxu0 }
 0x309   : > { %v498_v55 = vpop.f32.mrb[5].mxu0 }
 0x30a   : > { %v1006_v56 = vpop.f32.mrb[6].mxu0 }
 0x30b   : > { %v514_v57 = vpack.c.bf16 %v1006_v56, %v1005_v54  ;;  %v501_v58 = vpop.f32.mrb[7].mxu0  ;;  %v812_v56 = vld [vmem:[%s308_s29 + $0x18] sm:$0xff] }
 0x30c   : > { %v513_v59 = vpack.c.bf16 %v501_v58, %v498_v55 }
 0x30e   : > { %1009 = vmatprep.mubr.msk.bf16.mxu1 %vm350_vm0, %v513_v59 }
 0x30f   : > { %1010 = vmatmul.mubr.msk.bf16.vlgmr.msra.gmra.mrb[0].mxu1 %vm350_vm0, %v514_v57 }
 0x310   : > { %v1017_v60 = vpop.f32.mrb[8].mxu0 }
 0x311   : > { %v626_v61 = vpop.f32.mrb[9].mxu0  ;;  %v647_v3 = vsel %vm350_vm0, %v1017_v60, -inf }
 0x312   : > { %v1018_v62 = vpop.f32.mrb[10].mxu0  ;;  %v641_v63 = vsel %vm350_vm0, %v626_v61, -inf }
 0x313   : > { %642 = vmax.xlane.f32.xlu0 %v641_v63  ;;  %v629_v1 = vpop.f32.mrb[11].mxu0  ;;  %v650_v4 = vsel %vm350_vm0, %v1018_v62, -inf }
 0x314   : > { %v644_v2 = vsel %vm350_vm0, %v629_v1, -inf }
 0x315   : > { %645 = vmax.xlane.f32.xlu1 %v644_v2 }
 0x317   : > { %648 = vmax.xlane.f32.xlu0 %v647_v3 }
 0x31b   : > { %651 = vmax.xlane.f32.xlu0 %v650_v4 }
 0x3a0   : > { %v643_v5 = vpop.xlane.xlu0 %642 }
 0x3a1   : > { %v653_v7 = vsub.f32 %v626_v61, %v643_v5 }
 0x3a2   : > { %v646_v6 = vpop.xlane.xlu1 %645 }
 0x3a3   : > { %v654_v8 = vsub.f32 %v629_v1, %v646_v6  ;;  %v657_v12 = vmul.f32 1.442695, %v653_v7 }
 0x3a4   : > { %v649_v9 = vpop.xlane.xlu0 %648 }
 0x3a5   : > { %v659_v10 = vmul.f32 1.442695, %v654_v8  ;;  %v655_v11 = vsub.f32 %v1017_v60, %v649_v9  ;;  %v810_v60 = vld [vmem:[%s308_s29 + $0x8] sm:$0xff] }
 0x3a7   : > { %1103 = vpow2.f32 %v659_v10  ;;  %v661_v13 = vmul.f32 1.442695, %v655_v11 }
 0x3a8   : > { %v652_v14 = vpop.xlane.xlu0 %651 }
 0x3a9   : > { %1105 = vpow2.f32 %v661_v13  ;;  %v656_v15 = vsub.f32 %v1018_v62, %v652_v14 }
 0x3aa   : > { %1107 = vpow2.f32 %v657_v12 }
 0x3ab   : > { %v663_v16 = vmul.f32 1.442695, %v656_v15 }
 0x3ad   : > { %1109 = vpow2.f32 %v663_v16 }
 0x3b1   : > { %v1104_v17 = vpop.eup %1103 }
 0x3b2   : > { %v668_v18 = vsel %vm350_vm0, %v1104_v17, 0.0 }
 0x3b3   : > { %v1106_v19 = vpop.eup %1105  ;;  %669 = vadd.xlane.f32.xlu1 %v668_v18 }
 0x3b4   : > { %v671_v20 = vsel %vm350_vm0, %v1106_v19, 0.0  ;;  %v1108_v21 = vpop.eup %1107 }
 0x3b5   : > { %672 = vadd.xlane.f32.xlu0 %v671_v20  ;;  %v665_v23 = vsel %vm350_vm0, %v1108_v21, 0.0 }
 0x3b7   : > { %v1110_v22 = vpop.eup %1109 }
 0x3b8   : > { %v674_v24 = vsel %vm350_vm0, %v1110_v22, 0.0 }
 0x3b9   : > { %666 = vadd.xlane.f32.xlu0 %v665_v23  ;;  %675 = vadd.xlane.f32.xlu1 %v674_v24 }
 0x3cf   : > { %687 = vrot.lane.b32.xlu0 %v1227_v0, %s1161_s16 }
 0x440   : > { %v670_v25 = vpop.xlane.xlu1 %669 }
 0x441   : > { %1111 = vrcp.f32 %v670_v25 }
 0x442   : > { %v673_v26 = vpop.xlane.xlu0 %672 }
 0x443   : > { %1113 = vrcp.f32 %v673_v26 }
 0x446   : > { %v667_v27 = vpop.xlane.xlu0 %666  ;;  %v676_v28 = vpop.xlane.xlu1 %675 }
 0x447   : > { %1115 = vrcp.f32 %v667_v27 }
 0x448   : > { %1117 = vrcp.f32 %v676_v28 }
 0x44a   : > { %v688_v32 = vpop.permute.xlu0 %687 }
 0x44b   : > { %1019 = vmatprep.subr.bf16.mxu1 %v688_v32  ;;  %v1112_v0 = vpop.eup %1111 }
 0x44c   : > { %1020 = vmatpush3.bf16.msra.mxu1 %v688_v32  ;;  %v682_v37 = vmul.f32 %v1112_v0, %v1104_v17 }
 0x44d   : > { %1025 = vmatprep.subr.bf16.mxu1 %v749_v31  ;;  %v1114_v33 = vpop.eup %1113 }
 0x44e   : > { %v683_v38 = vmul.f32 %v1114_v33, %v1106_v19 }
 0x451   : > { %v1116_v34 = vpop.eup %1115 }
 0x452   : > { %v1118_v35 = vpop.eup %1117  ;;  %v681_v36 = vmul.f32 %v1116_v34, %v1108_v21 }
 0x453   : > { %v684_v39 = vmul.f32 %v1118_v35, %v1110_v22 }
 0x454   : > { %v685_v40 = vpack.c.bf16 %v682_v37, %v681_v36 }
 0x455   : > { %v686_v41 = vpack.c.bf16 %v684_v39, %v683_v38 }
 0x456   : > { %1021 = vmatprep.mubr.msk.bf16.mxu1 %vm350_vm0, %v685_v40 }
 0x457   : > { %1022 = vmatmul.mubr.msk.bf16.vlgmr.msra.gmra.mrb[4].mxu1 %vm350_vm0, %v686_v41 }
 0x458   : > { %1026 = vmatpush3.bf16.msra.mxu1 %v749_v31 }
 0x52a   : > { %v1023_v42 = vpop.f32.mrb[4].mxu1 }
 0x52b   : > { %v730_v43 = vpop.f32.mrb[5].mxu1 }
 0x52c   : > { %v1024_v44 = vpop.f32.mrb[6].mxu1 }
 0x52d   : > { %v746_v45 = vpack.c.bf16 %v1024_v44, %v1023_v42  ;;  %v733_v46 = vpop.f32.mrb[7].mxu1 }
 0x52e   : > { %v745_v47 = vpack.c.bf16 %v733_v46, %v730_v43 }
 0x530   : > { %1027 = vmatprep.mubr.msk.bf16.mxu1 %vm350_vm0, %v745_v47 }
 0x531   : > { %1028 = vmatmul.mubr.msk.bf16.vlgmr.msra.gmra.mrb[0].mxu1 %vm350_vm0, %v746_v45 }
 0x604   : > { %v1029_v49 = vpop.f32.mrb[0].mxu1 }
 0x605   : > { %v1031_v51 = vadd.f32 %v1029_v49, %v958_v48  ;;  %v790_v52 = vpop.f32.mrb[1].mxu1 }
 0x606   : > { %v1032_v54 = vadd.f32 %v958_v48, %v790_v52  ;;  %v1030_v55 = vpop.f32.mrb[2].mxu1 }
 0x607   : > { %v815_v57 = vadd.f32 %v1031_v51, %v811_v50  ;;  %v1033_v58 = vadd.f32 %v1030_v55, %v958_v48  ;;  %v793_v59 = vpop.f32.mrb[3].mxu1 }
 0x608   : > { %v813_v61 = vadd.f32 %v1032_v54, %v809_v53  ;;  %v1034_v62 = vadd.f32 %v958_v48, %v793_v59 }
 0x609   : > { %820 = vst.msk [vmem:[%s318_s10 + $0x10] sm:$0xff] %vm817_vm1, %v815_v57  ;;  %v816_v63 = vadd.f32 %v1033_v58, %v812_v56 }
 0x60a   : > { %818 = vst.msk [vmem:[%s318_s10] sm:$0xff] %vm817_vm1, %v813_v61  ;;  %v814_v1 = vadd.f32 %v1034_v62, %v810_v60 }
 0x60b   : > { %821 = vst.msk [vmem:[%s318_s10 + $0x18] sm:$0xff] %vm817_vm1, %v816_v63 }
 0x60c   : > { %819 = vst.msk [vmem:[%s318_s10 + $0x8] sm:$0xff] %vm817_vm1, %v814_v1 }
 0x60d PF: > { %s15_s22 = sadd.s32 1, %s1157_s22   ;;  %s1316_s18 = smov %s1149_s20 }
 0x60e   : > { %p12_p7 = scmp.ge.s32.totalorder %s15_s22, 6   ;;  %s1317_s19 = smov %s1153_s21 }
 0x60f   : > { %s1318_s20 = smov %s1321_s23  ;;  %s1319_s21 = smov %s1325_s24 }
 0x610   :  { %14 = sbr.rel (!%p12_p7) target bundleno = 3 (0x3), region = 76 }

// kernel: seg_layer_forward.5
= control target key start
LH: loop header
LB: loop body
LE: loop exit
PB: predicated region body
PF: predicated region fallthrough
CT: control target
= control target key end

     0   :  { %s653_s24 = smov 0   ;;  %s763_s0 = inlined_call_operand.vmem [shape: f32[32,128], index: 0, kind: input, shape index: {}]   ;;  %s764_s1 = inlined_call_operand.vmem [shape: f32[128,32], index: 1, kind: input, shape index: {}]   ;;  %s765_s2 = inlined_call_operand.vmem [shape: f32[1,32], index: 2, kind: input, shape index: {}]   ;;  %s766_s3 = inlined_call_operand.vmem [shape: f32[1,32], index: 3, kind: input, shape index: {}]   ;;  %s767_s4 = inlined_call_operand.vmem [shape: f32[1,32], index: 4, kind: input, shape index: {}]   ;;  %s768_s5 = inlined_call_operand.vmem [shape: f32[32,64], index: 5, kind: input, shape index: {}]   ;;  %s769_s6 = inlined_call_operand.vmem [shape: f32[1,64], index: 6, kind: input, shape index: {}]   ;;  %s770_s7 = inlined_call_operand.vmem [shape: bf16[32,64], index: 7, kind: output, shape index: {}]  }
   0x1 LB: > { %s529_s25 = sadd.s32 4294967295, %s609_s24   ;;  %p533_p0 = scmp.ge.s32.totalorder %s609_s24, 1  ;;  %s609_s24 = sphi %s653_s24, %s17_s24  }
   0x2   : > { %p238_p1 = scmp.lt.s32.totalorder %s609_s24, 3 }
   0x4   : > { %p239_p2 = pnand %p533_p0, %p238_p1 }
   0x5   : > { %v286_v0 = vld [vmem:[%s764_s1] sm:$0xff] (!%p239_p2)  ;;  %v287_v1 = vld [vmem:[%s764_s1 + $0x8] sm:$0xff] (!%p239_p2)  ;;  %v288_v2 = vld [vmem:[%s764_s1 + $0x10] sm:$0xff] (!%p239_p2)  ;;  %v611_v3 = vmov (!%p239_p2), 0.0   ;;  %vm612_vm0 = vmmov (!%p239_p2), 0   ;;  %s534_s19 = sshll.u32 (!%p239_p2), %s529_s25, 1 }
   0x6   : > { %242 = sbr.rel (%p239_p2) target bundleno = 791 (0x317), region = 48  ;;  %561 = vmatprep.subr.bf16.mxu0 (!%p239_p2), %v611_v3  ;;  %v302_v4 = vpack.c.bf16 (!%p239_p2), %v287_v1, %v286_v0  ;;  %v289_v5 = vld [vmem:[%s764_s1 + $0x18] sm:$0xff] (!%p239_p2)  ;;  %577 = vmatprep.mubr.msk.bf16.mxu0 (!%p239_p2), %vm612_vm0, %v611_v3  ;;  %v290_v7 = vld [vmem:[%s764_s1 + $0x20] sm:$0xff] (!%p239_p2)  ;;  %v291_v8 = vld [vmem:[%s764_s1 + $0x28] sm:$0xff] (!%p239_p2)  ;;  %p271_p3 = scmp.lt.s32.totalorder (!%p239_p2), %s534_s19, 3  ;;  %vm360_vm1 = vcmask (!%p239_p2), 261120  }
   0x7   : > { %581 = vmatprep.subr.bf16.mxu1 (!%p239_p2), %v611_v3  ;;  %585 = vmatprep.mubr.msk.bf16.mxu1 (!%p239_p2), %vm612_vm0, %v611_v3  ;;  %v303_v6 = vpack.c.bf16 (!%p239_p2), %v289_v5, %v288_v2  ;;  %v304_v9 = vpack.c.bf16 (!%p239_p2), %v291_v8, %v290_v7  ;;  %v292_v10 = vld [vmem:[%s764_s1 + $0x30] sm:$0xff] (!%p239_p2)  ;;  %v293_v11 = vld [vmem:[%s764_s1 + $0x38] sm:$0xff] (!%p239_p2)  ;;  %v294_v13 = vld [vmem:[%s764_s1 + $0x40] sm:$0xff] (!%p239_p2)  ;;  %vm470_vm2 = vcmask (!%p239_p2), 519168  }
   0x8   : > { %562 = vmatpush3.bf16.msra.mxu0 (!%p239_p2), %v302_v4  ;;  %v305_v12 = vpack.c.bf16 (!%p239_p2), %v293_v11, %v292_v10  ;;  %v295_v14 = vld [vmem:[%s764_s1 + $0x48] sm:$0xff] (!%p239_p2)  ;;  %v296_v16 = vld [vmem:[%s764_s1 + $0x50] sm:$0xff] (!%p239_p2)  ;;  %v297_v17 = vld [vmem:[%s764_s1 + $0x58] sm:$0xff] (!%p239_p2) }
   0x9   : > { %563 = vmatprep.subr.bf16.mxu0 (!%p239_p2), %v611_v3  ;;  %v306_v15 = vpack.c.bf16 (!%p239_p2), %v295_v14, %v294_v13  ;;  %v307_v18 = vpack.c.bf16 (!%p239_p2), %v297_v17, %v296_v16  ;;  %v298_v19 = vld [vmem:[%s764_s1 + $0x60] sm:$0xff] (!%p239_p2)  ;;  %v299_v20 = vld [vmem:[%s764_s1 + $0x68] sm:$0xff] (!%p239_p2)  ;;  %v300_v22 = vld [vmem:[%s764_s1 + $0x70] sm:$0xff] (!%p239_p2) }
   0xa   : > { %v308_v21 = vpack.c.bf16 (!%p239_p2), %v299_v20, %v298_v19  ;;  %v301_v23 = vld [vmem:[%s764_s1 + $0x78] sm:$0xff] (!%p239_p2)  ;;  %v538_v28 = vld [vmem:[%s765_s2] ss:$0 sm:$0xff] (!%p239_p2)  ;;  %v406_v48 = vld [vmem:[%s768_s5 + $0x8] sm:$0xff] (!%p239_p2) }
   0xb   : > { %v309_v24 = vpack.c.bf16 (!%p239_p2), %v301_v23, %v300_v22  ;;  %v405_v47 = vld [vmem:[%s768_s5] sm:$0xff] (!%p239_p2)  ;;  %v407_v50 = vld [vmem:[%s768_s5 + $0x10] sm:$0xff] (!%p239_p2)  ;;  %v408_v51 = vld [vmem:[%s768_s5 + $0x18] sm:$0xff] (!%p239_p2) }
   0xc   : > { %564 = vmatpush3.bf16.msra.mxu0 (!%p239_p2), %v303_v6  ;;  %v409_v49 = vpack.c.bf16 (!%p239_p2), %v406_v48, %v405_v47  ;;  %v410_v52 = vpack.c.bf16 (!%p239_p2), %v408_v51, %v407_v50  ;;  %v539_v61 = vld [vmem:[%s766_s3] ss:$0 sm:$0xff] (!%p239_p2) }
   0xd   : > { %565 = vmatprep.subr.bf16.mxu0 %v611_v3  ;;  %s772_s19 = smov (!%p271_p3, %s534_s19), 3  ;;  %v540_v1 = vld [vmem:[%s767_s4] ss:$0 sm:$0xff] }
   0xe   : > { %s535_s10 = sshll.u32 %s772_s19, 3  ;;  %582 = vmatpush3.bf16.msra.mxu1 %v409_v49  ;;  %v541_v6 = vld [vmem:[%s769_s6] ss:$0 sm:$0xff]  ;;  %s537_s13 = sshll.u32 %s772_s19, 2 }
   0xf   : > { %s274_s17 = scalar_lea.vmem %s763_s0, %s535_s10  ;;  %583 = vmatprep.subr.bf16.mxu1 %v611_v3  ;;  %s280_s16 = scalar_lea.vmem %s770_s7, %s537_s13 }
  0x10   : > { %566 = vmatpush3.bf16.msra.mxu0 %v304_v9  ;;  %v283_v25 = vld [vmem:[%s274_s17] sm:$0xff]  ;;  %v284_v26 = vld [vmem:[%s274_s17 + $0x8] sm:$0xff] }
  0x11   : > { %567 = vmatprep.subr.bf16.mxu0 %v611_v3  ;;  %v285_v27 = vpack.c.bf16 %v284_v26, %v283_v25 }
  0x12   : > { %584 = vmatpush3.bf16.msra.mxu1 %v410_v52 }
  0x14   : > { %568 = vmatpush3.bf16.msra.mxu0 %v305_v12 }
  0x15   : > { %569 = vmatprep.subr.bf16.mxu0 %v611_v3 }
  0x18   : > { %570 = vmatpush3.bf16.msra.mxu0 %v306_v15 }
  0x19   : > { %571 = vmatprep.subr.bf16.mxu0 %v611_v3 }
  0x1c   : > { %572 = vmatpush3.bf16.msra.mxu0 %v307_v18 }
  0x1d   : > { %573 = vmatprep.subr.bf16.mxu0 %v611_v3 }
  0x20   : > { %574 = vmatpush3.bf16.msra.mxu0 %v308_v21 }
  0x21   : > { %575 = vmatprep.subr.bf16.mxu0 %v611_v3 }
  0x24   : > { %576 = vmatpush3.bf16.msra.mxu0 %v309_v24 }
  0x27   : > { %578 = vmatmul.mubr.bf16.vlgmr.msra.gmra.mrb[0].mxu0 %v285_v27 }
  0xfa   : > { %v351_v29 = vpop.f32.mrb[0].mxu0 }
  0xfb   : > { %v352_v30 = vadd.f32 %v538_v28, %v351_v29  ;;  %v579_v31 = vpop.f32.mrb[1].mxu0 }
  0xfc   : > { %v354_v32 = vpop.f32.mrb[2].mxu0 }
  0xfd   : > { %v355_v33 = vadd.f32 %v538_v28, %v354_v32  ;;  %v580_v34 = vpop.f32.mrb[3].mxu0  ;;  %v361_v35 = vsel %vm360_vm1, %v352_v30, 0.0 }
  0xfe   : > { %362 = vadd.xlane.f32.xlu0 %v361_v35 }
  0xff   : > { %v364_v36 = vsel %vm360_vm1, %v355_v33, 0.0 }
 0x102   : > { %365 = vadd.xlane.f32.xlu0 %v364_v36 }
 0x18b   : > { %v363_v37 = vpop.xlane.xlu0 %362 }
 0x18c   : > { %v368_v38 = vmul.f32 0.03125, %v363_v37 }
 0x18e   : > { %v370_v39 = vsub.f32 %v352_v30, %v368_v38 }
 0x18f   : > { %v366_v40 = vpop.xlane.xlu0 %365 }
 0x190   : > { %v369_v41 = vmul.f32 0.03125, %v366_v40  ;;  %v372_v42 = vmul.f32 %v370_v39, %v370_v39 }
 0x192   : > { %v371_v43 = vsub.f32 %v355_v33, %v369_v41  ;;  %v374_v44 = vsel %vm360_vm1, %v372_v42, 0.0 }
 0x193   : > { %375 = vadd.xlane.f32.xlu1 %v374_v44 }
 0x194   : > { %v373_v45 = vmul.f32 %v371_v43, %v371_v43 }
 0x196   : > { %v377_v46 = vsel %vm360_vm1, %v373_v45, 0.0 }
 0x197   : > { %378 = vadd.xlane.f32.xlu1 %v377_v46 }
 0x220   : > { %v376_v53 = vpop.xlane.xlu1 %375 }
 0x221   : > { %v380_v54 = vmul.f32 0.03125, %v376_v53 }
 0x223   : > { %v382_v55 = vadd.f32 1e-06, %v380_v54 }
 0x224   : > { %v379_v56 = vpop.xlane.xlu1 %378 }
 0x225   : > { %599 = vrsqrt.f32 %v382_v55  ;;  %v381_v57 = vmul.f32 0.03125, %v379_v56 }
 0x227   : > { %v383_v58 = vadd.f32 1e-06, %v381_v57 }
 0x229   : > { %601 = vrsqrt.f32 %v383_v58 }
 0x22f   : > { %v600_v59 = vpop.eup %599 }
 0x230   : > { %v386_v60 = vmul.f32 %v600_v59, %v370_v39 }
 0x232   : > { %v394_v0 = vmul.f32 %v539_v61, %v386_v60 }
 0x233   : > { %v602_v62 = vpop.eup %601 }
 0x234   : > { %v387_v63 = vmul.f32 %v602_v62, %v371_v43  ;;  %v402_v3 = vadd.f32 %v540_v1, %v394_v0 }
 0x236   : > { %v395_v2 = vmul.f32 %v539_v61, %v387_v63 }
 0x238   : > { %v403_v4 = vadd.f32 %v540_v1, %v395_v2 }
 0x23a   : > { %v404_v5 = vpack.c.bf16 %v403_v4, %v402_v3 }
 0x23c   : > { %586 = vmatmul.mubr.msk.bf16.vlgmr.msra.gmra.mrb[0].mxu1 %vm360_vm1, %v404_v5 }
 0x30f   : > { %v455_v7 = vpop.f32.mrb[0].mxu1 }
 0x310   : > { %v456_v8 = vadd.f32 %v541_v6, %v455_v7  ;;  %v587_v9 = vpop.f32.mrb[1].mxu1 }
 0x311   : > { %v458_v10 = vpop.f32.mrb[2].mxu1 }
 0x312   : > { %v547_v11 = vpack.c.bf16 %v456_v8, %v456_v8  ;;  %v459_v12 = vadd.f32 %v541_v6, %v458_v10  ;;  %v588_v13 = vpop.f32.mrb[3].mxu1 }
 0x314   : > { %471 = vst.msk [vmem:[%s280_s16] sm:$0xf] %vm470_vm2, %v547_v11  ;;  %v548_v14 = vpack.c.bf16 %v459_v12, %v459_v12 }
 0x316   : > { %472 = vst.msk [vmem:[%s280_s16 + $0x4] sm:$0xf] %vm470_vm2, %v548_v14 }
 0x317 PF: > { %s17_s24 = sadd.s32 1, %s609_s24  }
 0x318   : > { %p14_p4 = scmp.ge.s32.totalorder %s17_s24, 4  }
 0x31a   :  { %16 = sbr.rel (!%p14_p4) target bundleno = 1 (0x1), region = 78 }

// kernel: seg_layer_forward.7
= control target key start
LH: loop header
LB: loop body
LE: loop exit
PB: predicated region body
PF: predicated region fallthrough
CT: control target
= control target key end

     0   :  { %s1684_s17 = smov 0   ;;  %s1686_s18 = smov 0   ;;  %s2237_s0 = inlined_call_operand.vmem [shape: f32[2,64,32], index: 0, kind: input, shape index: {}, may-alias: {0,1,2}]   ;;  %s2238_s1 = inlined_call_operand.vmem [shape: f32[2,64,32], index: 1, kind: input, shape index: {}, may-alias: {0,1,2}]   ;;  %s2239_s2 = inlined_call_operand.vmem [shape: f32[2,64,32], index: 2, kind: input, shape index: {}, may-alias: {0,1,2}]   ;;  %s2240_s3 = inlined_call_operand.vmem [shape: f32[1,32], index: 3, kind: input, shape index: {}]   ;;  %s2241_s4 = inlined_call_operand.vmem [shape: f32[1,32], index: 4, kind: input, shape index: {}]   ;;  %s2242_s5 = inlined_call_operand.vmem [shape: f32[32,128], index: 5, kind: input, shape index: {}]   ;;  %s2243_s6 = inlined_call_operand.vmem [shape: f32[1,128], index: 6, kind: input, shape index: {}]   ;;  %s2244_s7 = inlined_call_operand.vmem [shape: f32[9,128], index: 7, kind: input, shape index: {}]   ;;  %s2245_s8 = inlined_call_operand.vmem [shape: f32[1,128], index: 8, kind: input, shape index: {}]   ;;  %s2246_s9 = inlined_call_operand.vmem [shape: f32[128,32], index: 9, kind: input, shape index: {}]   ;;  %s2247_s10 = inlined_call_operand.vmem [shape: f32[1,32], index: 10, kind: input, shape index: {}]   ;;  %s2248_s11 = inlined_call_operand.vmem [shape: f32[2,64,32], index: 11, kind: output, shape index: {}]  }
   0x1   :  { %2249 = sst [smem:[#allocation3_spill]] %s2237_s0  ;;  %s1688_s19 = smov 0  }
   0x2   :  { %s1690_s20 = smov 0   ;;  %s1692_s21 = smov 0  }
   0x3 LB: > { %s30_s22 = sadd.s32 1, %s1611_s19  ;;  %s33_s23 = sadd.s32 1, %s1615_s20  ;;  %s1619_s21 = sphi %s1692_s21, %s21_s21   ;;  %s1615_s20 = sphi %s1690_s20, %s2277_s20   ;;  %s1611_s19 = sphi %s1688_s19, %s2276_s19   ;;  %s1607_s18 = sphi %s1686_s18, %s2275_s18   ;;  %s1603_s17 = sphi %s1684_s17, %s2274_s17  }
   0x4   : > { %p31_p0 = scmp.ge.s32.totalorder %s30_s22, 2  ;;  %p1404_p1 = scmp.ge.s32.totalorder %s1619_s21, 1 }
   0x5   : > { %p420_p2 = scmp.lt.s32.totalorder %s1619_s21, 5 }
   0x6   : > { %s2279_s22 = smov (%p31_p0, %s30_s22), 0  ;;  %s2281_s23 = smov (!%p31_p0, %s33_s23), %s1615_s20 }
   0x7   : > { %p421_p3 = pnand %p1404_p1, %p420_p2  ;;  %p35_p4 = scmp.ge.s32.totalorder %s2281_s23, 2 }
   0x8   : > { %s1405_s24 = sshll.u32 (!%p421_p3), %s1603_s17, 2  ;;  %p493_p5 = scmp.lt.s32.totalorder (!%p421_p3), %s1607_s18, 1  ;;  %vm558_vm0 = vcmask (!%p421_p3), 261120   ;;  %v547_v42 = vld [vmem:[%s2242_s5] sm:$0xff] (!%p421_p3)  ;;  %v548_v43 = vld [vmem:[%s2242_s5 + $0x8] sm:$0xff] (!%p421_p3)  ;;  %v549_v45 = vld [vmem:[%s2242_s5 + $0x10] sm:$0xff] (!%p421_p3) }
   0x9   : > { %s2283_s23 = smov (%p35_p4, %s2281_s23), 0  ;;  %424 = sbr.rel (%p421_p3) target bundleno = 871 (0x367), region = 64 }
   0xa   : > { %2250 = sst [smem:[#allocation2_spill]] %s2283_s23  ;;  %p495_p6 = scmp.lt.s32.totalorder (!%p421_p3), %s1405_s24, 7  ;;  %v1801_v44 = vpack.c.bf16 (!%p421_p3), %v548_v43, %v547_v42  ;;  %v550_v46 = vld [vmem:[%s2242_s5 + $0x18] sm:$0xff] (!%p421_p3)  ;;  %v1621_v48 = vmov (!%p421_p3), 0.0   ;;  %vm1622_vm1 = vmmov (!%p421_p3), 0   ;;  %v1184_v43 = vld [vmem:[%s2246_s9 + $0x20] sm:$0xff] (!%p421_p3) }
   0xb   : > { %s1409_s25 = sadd.s32 (!%p421_p3), 4294967295, %s1405_s24  ;;  %s1445_s30 = sadd.s32 (!%p421_p3), 4, %s1405_s24  ;;  %v1811_v47 = vpack.c.bf16 (!%p421_p3), %v550_v46, %v549_v45  ;;  %v1186_v46 = vld [vmem:[%s2246_s9 + $0x30] sm:$0xff] (!%p421_p3) }
   0xc   : > { %p504_p7 = scmp.gt.s32.totalorder (!%p421_p3), %s1409_s25, 0  ;;  %p1410_p8 = scmp.lt.s32.totalorder (!%p421_p3), %s1409_s25, 7  ;;  %1466 = vmatprep.subr.bf16.mxu0 (!%p421_p3), %v1801_v44 }
   0xd   : > { %s2251_s0 = sld [smem:[#allocation3_spill]] (!%p421_p3)  ;;  %p1738_p9 = scmp.lt.s32.totalorder (!%p421_p3), %s1445_s30, 7  ;;  %1467 = vmatpush3.bf16.msra.mxu0 (!%p421_p3), %v1801_v44 }
   0xe   : > { %1468 = vmatprep.subr.bf16.mxu0 (!%p421_p3), %v1811_v47  ;;  %p815_p10 = scmp.gt.s32.totalorder (!%p421_p3), %s1603_s17, 0  ;;  %p820_p11 = scmp.lt.s32.totalorder (!%p421_p3), %s1603_s17, 1 }
  0x10   : > { %s2285_s18 = smov (!%p493_p5, %s1607_s18), 1  ;;  %s2289_s30 = smov (!%p1738_p9, %s1445_s30), 7 }
  0x11   : > { %s496_s26 = scalar_select %p495_p6, %s1405_s24, 7  ;;  %1469 = vmatpush3.bf16.msra.mxu0 %v1811_v47 }
  0x12   : > { %s1717_s27 = sshll.u32 %s2285_s18, 3  ;;  %s2291_s30 = smov (!%p1738_p9, %s2289_s30), 7  ;;  %1474 = vmatprep.subr.bf16.mxu0 %v1621_v48 }
  0x13   : > { %s498_s28 = sadd.s32 %s1717_s27, %s496_s26 }
  0x14   : > { %s1720_s29 = sshll.u32 %s498_s28, 3 }
  0x15   : > { %s500_s14 = scalar_lea.vmem %s2251_s0, %s1720_s29 }
  0x16   : > { %v1726_v0 = vld [vmem:[%s500_s14] sm:$0xff]  ;;  %v1728_v1 = vld [vmem:[%s500_s14 + $0x10] sm:$0xff]  ;;  %v1730_v2 = vld [vmem:[%s500_s14 + $0x8] sm:$0xff]  ;;  %s505_s15 = scalar_select %p504_p7, %s1409_s25, 0 }
  0x17   : > { %v559_v3 = vsel %vm558_vm0, %v1726_v0, 0.0  ;;  %v565_v4 = vsel %vm558_vm0, %v1728_v1, 0.0  ;;  %v1736_v5 = vld [vmem:[%s500_s14 + $0x18] sm:$0xff]  ;;  %v562_v6 = vsel %vm558_vm0, %v1730_v2, 0.0  ;;  %s527_s25 = sadd.s32 %s1717_s27, %s2291_s30 }
  0x18   : > { %560 = vadd.xlane.f32.xlu0 %v559_v3  ;;  %566 = vadd.xlane.f32.xlu1 %v565_v4  ;;  %s2287_s15 = smov (!%p1410_p8, %s505_s15), 7  ;;  %v568_v7 = vsel %vm558_vm0, %v1736_v5, 0.0  ;;  %s1422_s13 = sshll.u32 %s527_s25, 3 }
  0x19   : > { %s511_s18 = sadd.s32 %s2287_s15, %s1717_s27  ;;  %s529_s23 = scalar_lea.vmem %s2239_s2, %s1422_s13 }
  0x1a   : > { %s1416_s24 = sshll.u32 %s511_s18, 3  ;;  %v755_v10 = vld [vmem:[%s529_s23] sm:$0xff]  ;;  %s542_s23 = scalar_lea.vmem %s2248_s11, %s1720_s29 }
  0x1b   : > { %s513_s12 = scalar_lea.vmem %s2238_s1, %s1416_s24  ;;  %v756_v11 = vsel %vm558_vm0, %v755_v10, 0.0 }
  0x1c   : > { %563 = vadd.xlane.f32.xlu0 %v562_v6  ;;  %569 = vadd.xlane.f32.xlu1 %v568_v7  ;;  %v695_v8 = vld [vmem:[%s513_s12] sm:$0xff]  ;;  %s1913_s18 = scalar_select %p815_p10, 1, 0 }
  0x1d   : > { %v696_v9 = vsel %vm558_vm0, %v695_v8, 0.0  ;;  %s1923_s24 = scalar_select %p820_p11, 1, 0 }
  0x20   : > { %697 = vadd.xlane.f32.xlu0 %v696_v9  ;;  %757 = vadd.xlane.f32.xlu1 %v756_v11 }
  0xa5   : > { %v561_v12 = vpop.xlane.xlu0 %560  ;;  %v567_v13 = vpop.xlane.xlu1 %566 }
  0xa6   : > { %v572_v14 = vmul.f32 0.03125, %v561_v12  ;;  %v574_v15 = vmul.f32 0.03125, %v567_v13 }
  0xa8   : > { %v1762_v16 = vsub.f32 %v1726_v0, %v572_v14  ;;  %v1765_v17 = vsub.f32 %v1728_v1, %v574_v15  ;;  %v1427_v15 = vld [vmem:[%s2241_s4] ss:$0 sm:$0xff] }
  0xa9   : > { %v564_v18 = vpop.xlane.xlu0 %563  ;;  %v570_v19 = vpop.xlane.xlu1 %569 }
  0xaa   : > { %v573_v20 = vmul.f32 0.03125, %v564_v18  ;;  %v575_v21 = vmul.f32 0.03125, %v570_v19  ;;  %v580_v22 = vmul.f32 %v1762_v16, %v1762_v16  ;;  %v582_v23 = vmul.f32 %v1765_v17, %v1765_v17 }
  0xac   : > { %v1772_v24 = vsub.f32 %v1730_v2, %v573_v20  ;;  %v1775_v25 = vsub.f32 %v1736_v5, %v575_v21  ;;  %v584_v26 = vsel %vm558_vm0, %v580_v22, 0.0  ;;  %v590_v29 = vsel %vm558_vm0, %v582_v23, 0.0 }
  0xad   : > { %585 = vadd.xlane.f32.xlu0 %v584_v26  ;;  %v698_v27 = vpop.xlane.xlu0 %697  ;;  %v758_v34 = vpop.xlane.xlu1 %757 }
  0xae   : > { %v699_v28 = vmul.f32 0.03125, %v698_v27  ;;  %v581_v30 = vmul.f32 %v1772_v24, %v1772_v24  ;;  %v583_v31 = vmul.f32 %v1775_v25, %v1775_v25  ;;  %v759_v35 = vmul.f32 0.03125, %v758_v34 }
  0xb0   : > { %v1783_v32 = vsub.f32 %v695_v8, %v699_v28  ;;  %v587_v33 = vsel %vm558_vm0, %v581_v30, 0.0  ;;  %v593_v36 = vsel %vm558_vm0, %v583_v31, 0.0  ;;  %v1789_v38 = vsub.f32 %v755_v10, %v759_v35  ;;  %v1426_v8 = vld [vmem:[%s2240_s3] ss:$0 sm:$0xff] }
  0xb1   : > { %591 = vadd.xlane.f32.xlu0 %v590_v29  ;;  %588 = vadd.xlane.f32.xlu1 %v587_v33 }
  0xb2   : > { %v701_v37 = vmul.f32 %v1783_v32, %v1783_v32  ;;  %v761_v40 = vmul.f32 %v1789_v38, %v1789_v38 }
  0xb4   : > { %v702_v39 = vsel %vm558_vm0, %v701_v37, 0.0  ;;  %v762_v41 = vsel %vm558_vm0, %v761_v40, 0.0  ;;  %v1180_v37 = vld [vmem:[%s2246_s9] sm:$0xff] }
  0xb5   : > { %594 = vadd.xlane.f32.xlu1 %v593_v36  ;;  %703 = vadd.xlane.f32.xlu0 %v702_v39  ;;  %v1182_v39 = vld [vmem:[%s2246_s9 + $0x10] sm:$0xff] }
  0xb9   : > { %763 = vadd.xlane.f32.xlu1 %v762_v41  ;;  %v1183_v41 = vld [vmem:[%s2246_s9 + $0x18] sm:$0xff] }
  0xba   : > { %v1197_v42 = vpack.c.bf16 %v1183_v41, %v1182_v39 }
 0x13a   : > { %v586_v49 = vpop.xlane.xlu0 %585 }
 0x13b   : > { %v596_v50 = vmul.f32 0.03125, %v586_v49  ;;  %v1188_v49 = vld [vmem:[%s2246_s9 + $0x40] sm:$0xff] }
 0x13d   : > { %v600_v51 = vadd.f32 1e-06, %v596_v50  ;;  %v1189_v50 = vld [vmem:[%s2246_s9 + $0x48] sm:$0xff] }
 0x13e   : > { %v589_v52 = vpop.xlane.xlu1 %588  ;;  %v592_v53 = vpop.xlane.xlu0 %591 }
 0x13f   : > { %1553 = vrsqrt.f32 %v600_v51  ;;  %v597_v54 = vmul.f32 0.03125, %v589_v52  ;;  %v598_v55 = vmul.f32 0.03125, %v592_v53  ;;  %v1200_v51 = vpack.c.bf16 %v1189_v50, %v1188_v49  ;;  %v1190_v52 = vld [vmem:[%s2246_s9 + $0x50] sm:$0xff]  ;;  %v1191_v53 = vld [vmem:[%s2246_s9 + $0x58] sm:$0xff] }
 0x141   : > { %v601_v56 = vadd.f32 1e-06, %v597_v54  ;;  %v602_v57 = vadd.f32 1e-06, %v598_v55  ;;  %v1201_v54 = vpack.c.bf16 %v1191_v53, %v1190_v52  ;;  %v1192_v55 = vld [vmem:[%s2246_s9 + $0x60] sm:$0xff] }
 0x142   : > { %v595_v58 = vpop.xlane.xlu1 %594  ;;  %v704_v59 = vpop.xlane.xlu0 %703 }
 0x143   : > { %1555 = vrsqrt.f32 %v601_v56  ;;  %v599_v60 = vmul.f32 0.03125, %v595_v58  ;;  %v705_v61 = vmul.f32 0.03125, %v704_v59  ;;  %v1193_v56 = vld [vmem:[%s2246_s9 + $0x68] sm:$0xff]  ;;  %v1194_v58 = vld [vmem:[%s2246_s9 + $0x70] sm:$0xff]  ;;  %v1195_v59 = vld [vmem:[%s2246_s9 + $0x78] sm:$0xff] }
 0x144   : > { %1557 = vrsqrt.f32 %v602_v57  ;;  %v1202_v57 = vpack.c.bf16 %v1193_v56, %v1192_v55 }
 0x145   : > { %v603_v62 = vadd.f32 1e-06, %v599_v60  ;;  %v706_v63 = vadd.f32 1e-06, %v705_v61  ;;  %v1203_v60 = vpack.c.bf16 %v1195_v59, %v1194_v58  ;;  %v825_v61 = vlaneseq }
 0x146   : > { %v764_v3 = vpop.xlane.xlu1 %763 }
 0x147   : > { %1559 = vrsqrt.f32 %v603_v62  ;;  %v765_v4 = vmul.f32 0.03125, %v764_v3  ;;  %v1889_v62 = vshrl.u32 %v825_v61, 7 }
 0x148   : > { %1561 = vrsqrt.f32 %v706_v63 }
 0x149   : > { %v1554_v6 = vpop.eup %1553  ;;  %v766_v9 = vadd.f32 1e-06, %v765_v4  ;;  %v829_v63 = vadd.s32 24, %v1889_v62  ;;  %v891_v3 = vsub.s32 4, %v1889_v62  ;;  %v887_v4 = vld [vmem:[%s2244_s7] sm:$0xff]  ;;  %vm902_vm3 = vcmp.lt.s32.totalorder %v1889_v62, 1 }
 0x14a   : > { %v608_v7 = vmul.f32 %v1554_v6, %v1762_v16  ;;  %v933_v6 = vsub.s32 1, %v1889_v62  ;;  %vm948_vm4 = vcmp.lt.s32.totalorder %v1889_v62, 7 }
 0x14b   : > { %1563 = vrsqrt.f32 %v766_v9  ;;  %v849_v9 = vand.u32 7, %v829_v63 }
 0x14c   : > { %v618_v13 = vmul.f32 %v1426_v8, %v608_v7  ;;  %v1032_v7 = vsub.s32 7, %v1889_v62 }
 0x14d   : > { %v1556_v10 = vpop.eup %1555  ;;  %vm1928_vm2 = vcmp.gt.s32.totalorder %v849_v9, 0  ;;  %vm1999_vm11 = vcmp.lt.s32.totalorder %v849_v9, 7 }
 0x14e   : > { %v1558_v11 = vpop.eup %1557  ;;  %v609_v12 = vmul.f32 %v1556_v10, %v1772_v24  ;;  %v628_v21 = vadd.f32 %v1427_v15, %v618_v13  ;;  %v1904_v10 = vld [vmem:[%s2243_s6] ss:$0 sm:$0xff]  ;;  %v1910_v13 = vrot.slane %v887_v4, %v891_v3 }
 0x14f   : > { %v610_v14 = vmul.f32 %v1558_v11, %v1765_v17  ;;  %v1020_v11 = vsub.s32 6, %v1889_v62 }
 0x150   : > { %v619_v18 = vmul.f32 %v1426_v8, %v609_v12  ;;  %v1908_v12 = vadd.s32 8, %v1889_v62 }
 0x151   : > { %v1560_v19 = vpop.eup %1559  ;;  %v620_v23 = vmul.f32 %v1426_v8, %v610_v14  ;;  %v921_v14 = vsub.s32 0, %v1889_v62 }
 0x152   : > { %v1562_v16 = vpop.eup %1561  ;;  %v611_v20 = vmul.f32 %v1560_v19, %v1775_v25  ;;  %v629_v22 = vadd.f32 %v1427_v15, %v619_v18  ;;  %v1916_v19 = vrot.slane %v887_v4, %v933_v6 }
 0x153   : > { %v708_v26 = vmul.f32 %v1562_v16, %v1783_v32  ;;  %v630_v17 = vadd.f32 %v1427_v15, %v620_v23  ;;  %v1918_v16 = vrot.slane %v887_v4, %v1032_v7 }
 0x154   : > { %v632_v27 = vpack.c.bf16 %v629_v22, %v628_v21  ;;  %v621_v24 = vmul.f32 %v1426_v8, %v611_v20  ;;  %v967_v21 = vsub.s32 2, %v1889_v62 }
 0x155   : > { %v709_v29 = vmul.f32 %v1426_v8, %v708_v26  ;;  %v1564_v31 = vpop.eup %1563 }
 0x156   : > { %1470 = vmatprep.mubr.msk.bf16.mxu0 %vm558_vm0, %v632_v27  ;;  %v631_v28 = vadd.f32 %v1427_v15, %v621_v24  ;;  %v768_v25 = vmul.f32 %v1564_v31, %v1789_v38  ;;  %v1181_v38 = vld [vmem:[%s2246_s9 + $0x8] sm:$0xff]  ;;  %v1934_v24 = vrot.slane %v887_v4, %v1020_v11 }
 0x157   : > { %v710_v32 = vadd.f32 %v1427_v15, %v709_v29  ;;  %v1196_v40 = vpack.c.bf16 %v1181_v38, %v1180_v37  ;;  %v1003_v29 = vsub.s32 5, %v1889_v62  ;;  %v822_v37 = vstv %s1923_s24 }
 0x158   : > { %v633_v30 = vpack.c.bf16 %v631_v28, %v630_v17  ;;  %v769_v33 = vmul.f32 %v1426_v8, %v768_v25  ;;  %v828_v8 = vadd.s32 16, %v1889_v62  ;;  %v835_v17 = vand.u32 7, %v1908_v12 }
 0x159   : > { %v711_v34 = vpack.c.bf16 %v710_v32, %v710_v32  ;;  %1490 = vmatprep.subr.bf16.mxu1 %v1196_v40  ;;  %v985_v28 = vsub.s32 3, %v1889_v62  ;;  %v1942_v25 = vrot.slane %v887_v4, %v921_v14  ;;  %v817_v32 = vstv %s1913_s18 }
 0x15a   : > { %1471 = vmatmul.mubr.msk.bf16.vlgmr.msra.gmra.mrb[0].mxu0 %vm558_vm0, %v633_v30  ;;  %v770_v35 = vadd.f32 %v1427_v15, %v769_v33  ;;  %1491 = vmatpush3.bf16.msra.mxu1 %v1196_v40  ;;  %v830_v15 = vadd.s32 32, %v1889_v62  ;;  %v842_v20 = vand.u32 7, %v828_v8  ;;  %vm1960_vm6 = vcmp.eq.s32.totalorder %v817_v32, 1 }
 0x15b   : > { %1475 = vmatpush3.bf16.msra.mxu0 %v1801_v44  ;;  %1478 = vmatprep.mubr.msk.bf16.mxu0 %vm1622_vm1, %v1621_v48  ;;  %vm1982_vm7 = vcmp.lt.s32.totalorder %v835_v17, 7  ;;  %vm1995_vm10 = vcmp.eq.s32.totalorder %v822_v37, 1  ;;  %vm2035_vm13 = vcmp.gt.s32.totalorder %v835_v17, 0 }
 0x15c   : > { %1476 = vmatprep.subr.bf16.mxu0 %v1621_v48  ;;  %v771_v36 = vpack.c.bf16 %v770_v35, %v770_v35  ;;  %1492 = vmatprep.subr.bf16.mxu1 %v1197_v42  ;;  %v856_v33 = vand.u32 7, %v830_v15  ;;  %vm1946_vm5 = vcmp.gt.s32.totalorder %v842_v20, 0  ;;  %vm2003_vm12 = vcmp.lt.s32.totalorder %v842_v20, 7 }
 0x15e   : > { %1493 = vmatpush3.bf16.msra.mxu1 %v1197_v42  ;;  %vm1986_vm8 = vcmp.gt.s32.totalorder %v856_v33, 0  ;;  %vm1990_vm9 = vcmp.lt.s32.totalorder %v856_v33, 7 }
 0x15f   : > { %1477 = vmatpush3.bf16.msra.mxu0 %v1811_v47 }
 0x160   : > { %1482 = vmatprep.subr.bf16.mxu0 %v1621_v48 }
 0x162   : > { %1479 = vmatmul.mubr.msk.bf16.vlgmr.msra.gmra.mrb[4].mxu0 %vm558_vm0, %v711_v34 }
 0x163   : > { %1483 = vmatpush3.bf16.msra.mxu0 %v1801_v44  ;;  %1486 = vmatprep.mubr.msk.bf16.mxu0 %vm1622_vm1, %v1621_v48  ;;  %v1185_v44 = vld [vmem:[%s2246_s9 + $0x28] sm:$0xff] }
 0x164   : > { %1484 = vmatprep.subr.bf16.mxu0 %v1621_v48  ;;  %v1198_v45 = vpack.c.bf16 %v1185_v44, %v1184_v43  ;;  %v1964_v44 = vrot.slane %v887_v4, %v985_v28 }
 0x166   : > { %1494 = vmatprep.subr.bf16.mxu1 %v1198_v45 }
 0x167   : > { %1485 = vmatpush3.bf16.msra.mxu0 %v1811_v47  ;;  %v1187_v47 = vld [vmem:[%s2246_s9 + $0x38] sm:$0xff]  ;;  %1495 = vmatpush3.bf16.msra.mxu1 %v1198_v45  ;;  %v1966_v45 = vrot.slane %v887_v4, %v1003_v29 }
 0x168   : > { %v1199_v48 = vpack.c.bf16 %v1187_v47, %v1186_v46 }
 0x16a   : > { %1487 = vmatmul.mubr.msk.bf16.vlgmr.msra.gmra.mrb[8].mxu0 %vm558_vm0, %v771_v36  ;;  %1496 = vmatprep.subr.bf16.mxu1 %v1199_v48  ;;  %v1950_v36 = vrot.slane %v887_v4, %v967_v21 }
 0x16b   : > { %1497 = vmatpush3.bf16.msra.mxu1 %v1199_v48 }
 0x16c   : > { %1498 = vmatprep.subr.bf16.mxu1 %v1200_v51 }
 0x16f   : > { %1499 = vmatpush3.bf16.msra.mxu1 %v1200_v51 }
 0x170   : > { %1500 = vmatprep.subr.bf16.mxu1 %v1201_v54 }
 0x173   : > { %1501 = vmatpush3.bf16.msra.mxu1 %v1201_v54 }
 0x174   : > { %1502 = vmatprep.subr.bf16.mxu1 %v1202_v57 }
 0x177   : > { %1503 = vmatpush3.bf16.msra.mxu1 %v1202_v57 }
 0x178   : > { %1504 = vmatprep.subr.bf16.mxu1 %v1203_v60 }
 0x17b   : > { %1505 = vmatpush3.bf16.msra.mxu1 %v1203_v60 }
 0x22d   : > { %v1472_v18 = vpop.f32.mrb[0].mxu0 }
 0x22e   : > { %v1926_v22 = vadd.f32 %v1472_v18, %v1904_v10  ;;  %v680_v23 = vpop.f32.mrb[1].mxu0 }
 0x22f   : > { %v1473_v27 = vpop.f32.mrb[2].mxu0  ;;  %v681_v34 = vadd.f32 %v1904_v10, %v680_v23 }
 0x230   : > { %v1940_v30 = vadd.f32 %v1473_v27, %v1904_v10  ;;  %v683_v31 = vpop.f32.mrb[3].mxu0  ;;  %v900_v38 = vrot.slane %v1926_v22, 7  ;;  %v946_v39 = vrot.slane %v1926_v22, 1  ;;  %v895_v57 = vmul.f32 %v1910_v13, %v1926_v22 }
 0x231   : > { %v1958_v42 = vadd.f32 %v1904_v10, %v683_v31  ;;  %v898_v51 = vrot.slane %v681_v34, 7  ;;  %v944_v58 = vrot.slane %v681_v34, 1  ;;  %v2012_v63 = vmul.f32 %v1910_v13, %v681_v34 }
 0x232   : > { %v947_v40 = vrot.slane %v1940_v30, 1  ;;  %v977_v41 = vrot.slane %v1940_v30, 7  ;;  %v936_v3 = vmul.f32 %v1916_v19, %v681_v34  ;;  %v896_v8 = vmul.f32 %v1910_v13, %v1940_v30 }
 0x233   : > { %v899_v52 = vrot.slane %v1958_v42, 7  ;;  %v945_v59 = vrot.slane %v1958_v42, 1  ;;  %v2044_v27 = vmul.f32 %v1918_v16, %v1940_v30  ;;  %v937_v28 = vmul.f32 %v1916_v19, %v1958_v42 }
 0x234   : > { %v1974_v46 = vsel %vm948_vm4, %v946_v39, %v947_v40  ;;  %v1980_v47 = vsel %vm902_vm3, %v900_v38, %v977_v41  ;;  %v938_v29 = vmul.f32 %v1916_v19, %v1926_v22  ;;  %v2052_v17 = vmul.f32 %v1918_v16, %v1926_v22 }
 0x235   : > { %v749_v53 = vpop.f32.mrb[4].mxu0  ;;  %v2017_v4 = vsel %vm902_vm3, %v898_v51, %v899_v52  ;;  %v2021_v6 = vsel %vm902_vm3, %v899_v52, %v900_v38  ;;  %v2032_v12 = vsel %vm948_vm4, %v944_v58, %v945_v59  ;;  %v964_v23 = vsel %vm1990_vm9, %v1974_v46, 0.0 }
 0x236   : > { %v750_v60 = vadd.f32 %v1904_v10, %v749_v53  ;;  %v1480_v61 = vpop.f32.mrb[5].mxu0  ;;  %v917_v9 = vsel %vm1928_vm2, %v2017_v4, 0.0  ;;  %v980_v34 = vsel %vm1946_vm5, %v2017_v4, 0.0  ;;  %v1016_v37 = vsel %vm1928_vm2, %v1980_v47, 0.0 }
 0x237   : > { %v752_v7 = vpop.f32.mrb[6].mxu0  ;;  %v925_v15 = vmul.f32 %v1942_v25, %v917_v9  ;;  %v894_v38 = vmul.f32 %v1910_v13, %v1958_v42  ;;  %v972_v52 = vmul.f32 %v1950_v36, %v964_v23  ;;  %v981_v61 = vsel %vm1928_vm2, %v2021_v6, 0.0 }
 0x238   : > { %v819_v11 = vsel %vm1960_vm6, %v750_v60, 0.0  ;;  %v1481_v14 = vpop.f32.mrb[7].mxu0  ;;  %v982_v60 = vsel %vm1986_vm8, %v1980_v47, 0.0  ;;  %v988_v13 = vmul.f32 %v1964_v44, %v980_v34  ;;  %v918_v9 = vsel %vm1986_vm8, %v2021_v6, 0.0 }
 0x239   : > { %v897_v20 = vrot.slane %v819_v11, 7  ;;  %v943_v21 = vrot.slane %v819_v11, 1  ;;  %v929_v31 = vadd.f32 %v925_v15, %v895_v57  ;;  %v935_v57 = vmul.f32 %v1916_v19, %v819_v11 }
 0x23a   : > { %v997_v19 = vsel %vm1982_vm7, %v2032_v12, 0.0  ;;  %v926_v11 = vmul.f32 %v1942_v25, %v918_v9  ;;  %v999_v54 = vsel %vm1999_vm11, %v1974_v46, 0.0  ;;  %v1024_v50 = vmul.f32 %v1934_v24, %v1016_v37 }
 0x23b   : > { %v905_v32 = vsel %vm902_vm3, %v897_v20, %v898_v51  ;;  %v952_v33 = vsel %vm948_vm4, %v943_v21, %v944_v58  ;;  %v941_v51 = vadd.f32 %v937_v28, %v929_v31  ;;  %v2090_v28 = vsel %vm948_vm4, %v945_v59, %v946_v39 }
 0x23c   : > { %v916_v43 = vsel %vm1946_vm5, %v905_v32, 0.0  ;;  %v979_v59 = vsel %vm2035_vm13, %v905_v32, 0.0  ;;  %v998_v30 = vsel %vm2003_vm12, %v2090_v28, 0.0 }
 0x23d   : > { %v924_v53 = vmul.f32 %v1942_v25, %v916_v43  ;;  %v809_v58 = vpop.f32.mrb[8].mxu0  ;;  %v963_v43 = vsel %vm1999_vm11, %v2090_v28, 0.0 }
 0x23e   : > { %v810_v7 = vadd.f32 %v1904_v10, %v809_v58  ;;  %v1488_v14 = vpop.f32.mrb[9].mxu0  ;;  %v961_v10 = vsel %vm1982_vm7, %v952_v33, 0.0  ;;  %v930_v58 = vadd.f32 %v926_v11, %v896_v8  ;;  %v990_v33 = vmul.f32 %v1964_v44, %v982_v60 }
 0x23f   : > { %v928_v15 = vadd.f32 %v924_v53, %v894_v38  ;;  %v812_v23 = vpop.f32.mrb[10].mxu0  ;;  %v962_v38 = vsel %vm2003_vm12, %v2032_v12, 0.0  ;;  %v969_v62 = vmul.f32 %v1950_v36, %v961_v10 }
 0x240   : > { %v824_v31 = vsel %vm1995_vm10, %v810_v7, 0.0  ;;  %v1489_v34 = vpop.f32.mrb[11].mxu0  ;;  %v970_v7 = vmul.f32 %v1950_v36, %v962_v38  ;;  %v942_v9 = vadd.f32 %v938_v29, %v930_v58  ;;  %v971_v29 = vmul.f32 %v1950_v36, %v963_v43 }
 0x241   : > { %v940_v22 = vadd.f32 %v936_v3, %v928_v15  ;;  %v901_v53 = vrot.slane %v824_v31, 7  ;;  %v995_v39 = vrot.slane %v824_v31, 1  ;;  %v987_v38 = vmul.f32 %v1964_v44, %v979_v59 }
 0x242   : > { %v976_v15 = vadd.f32 %v972_v52, %v942_v9  ;;  %v975_v34 = vadd.f32 %v971_v29, %v941_v51  ;;  %v1007_v43 = vmul.f32 %v1966_v45, %v999_v54  ;;  %v1037_v36 = vmul.f32 %v1918_v16, %v824_v31 }
 0x243   : > { %v906_v12 = vsel %vm902_vm3, %v901_v53, %v897_v20  ;;  %v996_v3 = vsel %vm948_vm4, %v947_v40, %v995_v39  ;;  %v1013_v8 = vsel %vm902_vm3, %v977_v41, %v901_v53  ;;  %v1042_v20 = vsel %vm948_vm4, %v995_v39, %v943_v21 }
 0x244   : > { %v915_v32 = vsel %vm2035_vm13, %v906_v12, 0.0  ;;  %v1000_v60 = vsel %vm1990_vm9, %v996_v3, 0.0  ;;  %v989_v41 = vmul.f32 %v1964_v44, %v981_v61  ;;  %v1017_v11 = vsel %vm1986_vm8, %v1013_v8, 0.0  ;;  %v1433_v44 = vld [vmem:[%s2244_s7 + $0x8] ss:$0 sm:$0xff] }
 0x245   : > { %v923_v14 = vmul.f32 %v1942_v25, %v915_v32  ;;  %v1008_v40 = vmul.f32 %v1966_v45, %v1000_v60  ;;  %v974_v23 = vadd.f32 %v970_v7, %v940_v22  ;;  %v1015_v25 = vsel %vm1946_vm5, %v2021_v6, 0.0 }
 0x246   : > { %v994_v52 = vadd.f32 %v990_v33, %v976_v15  ;;  %v1006_v61 = vmul.f32 %v1966_v45, %v998_v30  ;;  %v1025_v51 = vmul.f32 %v1934_v24, %v1017_v11  ;;  %v1046_v35 = vsel %vm1990_vm9, %v1042_v20, 0.0 }
 0x247   : > { %v927_v21 = vadd.f32 %v923_v14, %v2012_v63  ;;  %v992_v53 = vadd.f32 %v988_v13, %v974_v23  ;;  %v1023_v63 = vmul.f32 %v1934_v24, %v1015_v25  ;;  %v993_v10 = vadd.f32 %v989_v41, %v975_v34 }
 0x248   : > { %v1012_v58 = vadd.f32 %v1008_v40, %v994_v52  ;;  %v1044_v31 = vsel %vm2003_vm12, %v1974_v46, 0.0  ;;  %v1014_v39 = vsel %vm2035_vm13, %v2017_v4, 0.0  ;;  %v1005_v54 = vmul.f32 %v1966_v45, %v997_v19  ;;  %v1434_v45 = vld [vmem:[%s2245_s8] ss:$0 sm:$0xff] }
 0x249   : > { %v939_v49 = vadd.f32 %v935_v57, %v927_v21  ;;  %v1010_v6 = vadd.f32 %v1006_v61, %v992_v53  ;;  %v1045_v57 = vsel %vm1999_vm11, %v996_v3, 0.0  ;;  %v1011_v33 = vadd.f32 %v1007_v43, %v993_v10 }
 0x24a   : > { %v1029_v22 = vadd.f32 %v1025_v51, %v1012_v58  ;;  %v1054_v7 = vmul.f32 %v1433_v44, %v1046_v35  ;;  %v1053_v9 = vmul.f32 %v1433_v44, %v1045_v57  ;;  %v1052_v56 = vmul.f32 %v1433_v44, %v1044_v31 }
 0x24b   : > { %v973_v13 = vadd.f32 %v969_v62, %v939_v49  ;;  %v1027_v59 = vadd.f32 %v1023_v63, %v1010_v6  ;;  %v1028_v26 = vadd.f32 %v1024_v50, %v1011_v33  ;;  %v1022_v37 = vmul.f32 %v1934_v24, %v1014_v39 }
 0x24c   : > { %v1041_v55 = vadd.f32 %v1037_v36, %v1029_v22  ;;  %v1043_v4 = vsel %vm1982_vm7, %v2090_v28, 0.0 }
 0x24d   : > { %v991_v12 = vadd.f32 %v987_v38, %v973_v13  ;;  %v1039_v46 = vadd.f32 %v2052_v17, %v1027_v59  ;;  %v1040_v19 = vadd.f32 %v2044_v27, %v1028_v26  ;;  %v1034_v17 = vmul.f32 %v1918_v16, %v1958_v42 }
 0x24e   : > { %v1058_v3 = vadd.f32 %v1054_v7, %v1041_v55  ;;  %v1051_v29 = vmul.f32 %v1433_v44, %v1043_v4 }
 0x24f   : > { %v1009_v47 = vadd.f32 %v1005_v54, %v991_v12  ;;  %v1056_v18 = vadd.f32 %v1052_v56, %v1039_v46  ;;  %v1057_v24 = vadd.f32 %v1053_v9, %v1040_v19 }
 0x250   : > { %v2175_v32 = vadd.f32 %v1434_v45, %v1058_v3 }
 0x251   : > { %v1026_v8 = vadd.f32 %v1022_v37, %v1009_v47  ;;  %v2177_v60 = vadd.f32 %v1434_v45, %v1056_v18  ;;  %v2185_v14 = vadd.f32 %v1434_v45, %v1057_v24 }
 0x252   : > { %v2180_v48 = vmul.f32 0.70710677, %v2175_v32 }
 0x253   : > { %v1038_v20 = vadd.f32 %v1034_v17, %v1026_v8  ;;  %v2183_v28 = vmul.f32 0.70710677, %v2177_v60  ;;  %v2190_v42 = vmul.f32 0.70710677, %v2185_v14 }
 0x254   : > { %v1089_v15 = vand.u32 2147483647, %v2180_v48  ;;  %vm1081_vm14 = vcmp.ge.f32.partialorder %v2180_v48, 0.0 }
 0x255   : > { %v1055_v27 = vadd.f32 %v1051_v29, %v1038_v20  ;;  %v1087_v16 = vand.u32 2147483647, %v2183_v28  ;;  %v1088_v11 = vand.u32 2147483647, %v2190_v42  ;;  %vm1079_vm15 = vcmp.ge.f32.partialorder %v2183_v28, 0.0 }
 0x256   : > { %v1093_v30 = vmul.f32 0.3275911, %v1089_v15  ;;  %v1145_v53 = vsub.f32 0.0, %v1089_v15  ;;  %vm1080_vm1 = vcmp.ge.f32.partialorder %v2190_v42, 0.0 }
 0x257   : > { %v2192_v40 = vadd.f32 %v1434_v45, %v1055_v27  ;;  %v1091_v41 = vmul.f32 0.3275911, %v1087_v16  ;;  %v1092_v25 = vmul.f32 0.3275911, %v1088_v11  ;;  %v1143_v61 = vsub.f32 0.0, %v1087_v16 }
 0x258   : > { %v1097_v34 = vadd.f32 1.0, %v1093_v30  ;;  %v1144_v58 = vsub.f32 0.0, %v1088_v11  ;;  %v1149_v51 = vmul.f32 %v1145_v53, %v1089_v15 }
 0x259   : > { %v2196_v23 = vmul.f32 0.70710677, %v2192_v40  ;;  %v1095_v62 = vadd.f32 1.0, %v1091_v41  ;;  %v1096_v52 = vadd.f32 1.0, %v1092_v25  ;;  %v1147_v35 = vmul.f32 %v1143_v61, %v1087_v16 }
 0x25a   : > { %1565 = vrcp.f32 %v1097_v34  ;;  %v1148_v57 = vmul.f32 %v1144_v58, %v1088_v11  ;;  %v1156_v31 = vmul.f32 1.442695, %v1149_v51 }
 0x25b   : > { %v1086_v21 = vand.u32 2147483647, %v2196_v23  ;;  %1567 = vrcp.f32 %v1095_v62  ;;  %v1152_v50 = vmul.f32 1.442695, %v1147_v35  ;;  %vm1078_vm2 = vcmp.ge.f32.partialorder %v2196_v23, 0.0 }
 0x25c   : > { %1569 = vrcp.f32 %v1096_v52  ;;  %v1154_v56 = vmul.f32 1.442695, %v1148_v57  ;;  %v1070_v23 = vmul.f32 0.5, %v2192_v40 }
 0x25d   : > { %v1090_v38 = vmul.f32 0.3275911, %v1086_v21  ;;  %v1142_v10 = vsub.f32 0.0, %v1086_v21 }
 0x25f   : > { %v1094_v43 = vadd.f32 1.0, %v1090_v38  ;;  %v1146_v55 = vmul.f32 %v1142_v10, %v1086_v21 }
 0x261   : > { %1571 = vrcp.f32 %v1094_v43  ;;  %v1150_v4 = vmul.f32 1.442695, %v1146_v55 }
 0x262   : > { %1573 = vpow2.f32 %v1156_v31 }
 0x263   : > { %1575 = vpow2.f32 %v1152_v50 }
 0x264   : > { %v1566_v49 = vpop.eup %1565  ;;  %1577 = vpow2.f32 %v1154_v56 }
 0x265   : > { %v1568_v36 = vpop.eup %1567  ;;  %v1109_v6 = vmul.f32 1.0614054, %v1566_v49  ;;  %1579 = vpow2.f32 %v1150_v4 }
 0x266   : > { %v1107_v63 = vmul.f32 1.0614054, %v1568_v36  ;;  %v1570_v13 = vpop.eup %1569 }
 0x267   : > { %v1113_v44 = vadd.f32 -1.4531521, %v1109_v6  ;;  %v1108_v39 = vmul.f32 1.0614054, %v1570_v13 }
 0x268   : > { %v1111_v22 = vadd.f32 -1.4531521, %v1107_v63  ;;  %v1623_v63 = vmov -1.0  }
 0x269   : > { %v1117_v59 = vmul.f32 %v1566_v49, %v1113_v44  ;;  %v1112_v12 = vadd.f32 -1.4531521, %v1108_v39  ;;  %v1085_v10 = vsel %vm1081_vm14, 1.0, %v1623_v63  ;;  %v1083_v48 = vsel %vm1079_vm15, 1.0, %v1623_v63 }
 0x26a   : > { %v1115_v54 = vmul.f32 %v1568_v36, %v1111_v22  ;;  %v1084_v39 = vsel %vm1080_vm1, 1.0, %v1623_v63  ;;  %v1082_v55 = vsel %vm1078_vm2, 1.0, %v1623_v63 }
 0x26b   : > { %v1572_v33 = vpop.eup %1571  ;;  %v1121_v9 = vadd.f32 1.4214138, %v1117_v59  ;;  %v1116_v3 = vmul.f32 %v1570_v13, %v1112_v12  ;;  %v1073_v59 = vmul.f32 0.5, %v2175_v32  ;;  %v1435_v32 = vld [vmem:[%s2247_s10] ss:$0 sm:$0xff] }
 0x26c   : > { %v1106_v7 = vmul.f32 1.0614054, %v1572_v33  ;;  %v1119_v46 = vadd.f32 1.4214138, %v1115_v54  ;;  %v1574_v62 = vpop.eup %1573 }
 0x26d   : > { %v1125_v47 = vmul.f32 %v1566_v49, %v1121_v9  ;;  %v1120_v45 = vadd.f32 1.4214138, %v1116_v3  ;;  %v1576_v21 = vpop.eup %1575 }
 0x26e   : > { %v1110_v26 = vadd.f32 -1.4531521, %v1106_v7  ;;  %v1123_v37 = vmul.f32 %v1568_v36, %v1119_v46  ;;  %v1578_v35 = vpop.eup %1577  ;;  %v1071_v46 = vmul.f32 0.5, %v2177_v60 }
 0x26f   : > { %v1129_v19 = vadd.f32 -0.28449672, %v1125_v47  ;;  %v1124_v24 = vmul.f32 %v1570_v13, %v1120_v45  ;;  %v1580_v22 = vpop.eup %1579 }
 0x270   : > { %v1114_v18 = vmul.f32 %v1572_v33, %v1110_v26  ;;  %v1127_v8 = vadd.f32 -0.28449672, %v1123_v37 }
 0x271   : > { %v1133_v20 = vmul.f32 %v1566_v49, %v1129_v19  ;;  %v1128_v15 = vadd.f32 -0.28449672, %v1124_v24 }
 0x272   : > { %v1118_v17 = vadd.f32 1.4214138, %v1114_v18  ;;  %v1131_v29 = vmul.f32 %v1568_v36, %v1127_v8 }
 0x273   : > { %v1137_v16 = vadd.f32 0.2548296, %v1133_v20  ;;  %v1132_v11 = vmul.f32 %v1570_v13, %v1128_v15 }
 0x274   : > { %v1122_v27 = vmul.f32 %v1572_v33, %v1118_v17  ;;  %v1135_v30 = vadd.f32 0.2548296, %v1131_v29 }
 0x275   : > { %v1141_v34 = vmul.f32 %v1566_v49, %v1137_v16  ;;  %v1136_v38 = vadd.f32 0.2548296, %v1132_v11 }
 0x276   : > { %v1126_v41 = vadd.f32 -0.28449672, %v1122_v27  ;;  %v1139_v25 = vmul.f32 %v1568_v36, %v1135_v30 }
 0x277   : > { %v1161_v43 = vmul.f32 %v1574_v62, %v1141_v34  ;;  %v1140_v58 = vmul.f32 %v1570_v13, %v1136_v38 }
 0x278   : > { %v1130_v52 = vmul.f32 %v1572_v33, %v1126_v41  ;;  %v1159_v53 = vmul.f32 %v1576_v21, %v1139_v25 }
 0x279   : > { %v1165_v51 = vsub.f32 1.0, %v1161_v43  ;;  %v1160_v49 = vmul.f32 %v1578_v35, %v1140_v58 }
 0x27a   : > { %v1134_v61 = vadd.f32 0.2548296, %v1130_v52  ;;  %v1163_v6 = vsub.f32 1.0, %v1159_v53 }
 0x27b   : > { %v1169_v36 = vmul.f32 %v1165_v51, %v1085_v10  ;;  %v1164_v50 = vsub.f32 1.0, %v1160_v49 }
 0x27c   : > { %v1138_v44 = vmul.f32 %v1572_v33, %v1134_v61  ;;  %v1167_v31 = vmul.f32 %v1163_v6, %v1083_v48  ;;  %v1072_v33 = vmul.f32 0.5, %v2185_v14 }
 0x27d   : > { %v1173_v28 = vadd.f32 1.0, %v1169_v36  ;;  %v1168_v54 = vmul.f32 %v1164_v50, %v1084_v39 }
 0x27e   : > { %v1158_v57 = vmul.f32 %v1580_v22, %v1138_v44  ;;  %v1171_v42 = vadd.f32 1.0, %v1167_v31 }
 0x27f   : > { %v1172_v12 = vadd.f32 1.0, %v1168_v54  ;;  %v1177_v9 = vmul.f32 %v1173_v28, %v1073_v59 }
 0x280   : > { %v1162_v13 = vsub.f32 1.0, %v1158_v57  ;;  %v1175_v47 = vmul.f32 %v1171_v42, %v1071_v46 }
 0x281   : > { %v1176_v26 = vmul.f32 %v1172_v12, %v1072_v33 }
 0x282   : > { %v1166_v7 = vmul.f32 %v1162_v13, %v1082_v55 }
 0x283   : > { %v1179_v37 = vpack.c.bf16 %v1177_v9, %v1176_v26 }
 0x284   : > { %v1170_v56 = vadd.f32 1.0, %v1166_v7 }
 0x286   : > { %v1174_v3 = vmul.f32 %v1170_v56, %v1070_v23 }
 0x288   : > { %v1178_v4 = vpack.c.bf16 %v1175_v47, %v1174_v3 }
 0x28a   : > { %1506 = vmatprep.mubr.bf16.mxu1 %v1178_v4 }
 0x28b   : > { %1507 = vmatmul.mubr.bf16.vlgmr.msra.gmra.mrb[0].mxu1 %v1179_v37 }
 0x35e   : > { %v1508_v14 = vpop.f32.mrb[0].mxu1 }
 0x35f   : > { %v1254_v18 = vadd.f32 %v1508_v14, %v1435_v32  ;;  %v1245_v45 = vpop.f32.mrb[1].mxu1 }
 0x360   : > { %v1246_v60 = vadd.f32 %v1435_v32, %v1245_v45  ;;  %v1509_v40 = vpop.f32.mrb[2].mxu1 }
 0x361   : > { %v1262_v19 = vadd.f32 %v1254_v18, %v1728_v1  ;;  %v1257_v8 = vadd.f32 %v1509_v40, %v1435_v32  ;;  %v1248_v17 = vpop.f32.mrb[3].mxu1 }
 0x362   : > { %v1260_v24 = vadd.f32 %v1246_v60, %v1726_v0  ;;  %v1249_v20 = vadd.f32 %v1435_v32, %v1248_v17 }
 0x363   : > { %1266 = vst.msk [vmem:[%s542_s23 + $0x10] sm:$0xff] %vm558_vm0, %v1262_v19  ;;  %v1263_v29 = vadd.f32 %v1257_v8, %v1736_v5 }
 0x364   : > { %1264 = vst.msk [vmem:[%s542_s23] sm:$0xff] %vm558_vm0, %v1260_v24  ;;  %v1261_v27 = vadd.f32 %v1249_v20, %v1730_v2 }
 0x365   : > { %1267 = vst.msk [vmem:[%s542_s23 + $0x18] sm:$0xff] %vm558_vm0, %v1263_v29 }
 0x366   : > { %1265 = vst.msk [vmem:[%s542_s23 + $0x8] sm:$0xff] %vm558_vm0, %v1261_v27 }
 0x367 PF: > { %s21_s21 = sadd.s32 1, %s1619_s21   ;;  %s2273_s29 = sld [smem:[#allocation2_spill]] }
 0x368   : > { %p18_p12 = scmp.ge.s32.totalorder %s21_s21, 6   ;;  %s2274_s17 = smov %s1611_s19 }
 0x369   : > { %s2275_s18 = smov %s1615_s20  ;;  %s2276_s19 = smov %s2279_s22 }
 0x36a   :  { %20 = sbr.rel (!%p18_p12) target bundleno = 3 (0x3), region = 100 }
 0x36d   : > { %s2277_s20 = smov %s2273_s29 }

</bundles_post_ra>
